<compile_context>
chip_gen: v6e
topology: v6e:2x2x1
jax: 0.10.0
libtpu: 0.0.40
codegen_flags: <defaults>
</compile_context>

<pallas_src>
import jax
import jax.numpy as jnp
from jax.experimental import pallas as pl
from jax.experimental.pallas import tpu as pltpu

META_C = 4                  # META_CHANNELS
IN_C = 16                   # INPUT_CHANNELS
OUT_C = 32                  # OUTPUT_CHANNELS
H = W = 16                  # FEATURE_MAP_SIZE
B = 2
DILATION = 1
N_PIX = B * H * W           # 512 pixels
PN_C = 8                    # per-tap meta channels padded 4 -> 8 (lane-dense tap blocks)
PN_W = 9 * PN_C             # 72
H1_W = 9 * IN_C             # 144
W1_COLS = H1_W + 16         # 160: cols 0:144 h1 pre-act, col 144 constant-one, rest zero
ROW_BLOCK = 256             # grid=(2,): one row block per v7x TensorCore
BN_EPS = 1e-5


# --------------------------------- Pallas kernel ---------------------------------------
def _meta_kernel_body(pn_ref, feat_ref, mask_ref,
                      w1_ref, w2_ref, e_ref, wagg_ref, sh2_ref, o_ref):
    # weight_mlp1 (pn - p0 fold, BN1 scale+shift folded) -> relu          (MXU matmul 1)
    h1 = jnp.dot(pn_ref[...], w1_ref[...], preferred_element_type=jnp.float32)
    h1 = jnp.maximum(h1, 0.0)                                    # (R, 160)

    # weight_mlp2 (+bias via the constant-one h1 column), use_mask        (MXU matmul 2)
    logits = jnp.dot(h1, w2_ref[...], preferred_element_type=jnp.float32)
    logits = logits * mask_ref[...]                              # (R, 9)

    # use_attention: softmax over the 9 taps (XLU reduce, EUP exp + approx reciprocal)
    mx = jnp.max(logits, axis=-1, keepdims=True)
    e = jnp.exp(logits - mx)
    attn = e * pl.reciprocal(jnp.sum(e, axis=-1, keepdims=True), approx=True)

    # expand attention to per feature channel (0/1 matrix), weight, aggregate (MXU 3+4)
    attn_exp = jnp.dot(attn, e_ref[...], preferred_element_type=jnp.float32)  # (R, 144)
    wf = feat_ref[...] * attn_exp
    out = jnp.dot(wf, wagg_ref[...], preferred_element_type=jnp.float32) + sh2_ref[...]
    o_ref[...] = jnp.maximum(out, 0.0)                           # (R, 32)


# --------------------------------- param fusion ----------------------------------------
def fuse_params(p):
    """Fold BN scales, the pn-p0 subtraction, BN1 shift and the mlp2 bias into two
    block-structured matmul weights; build the 0/1 attention-expansion matrix."""
    w1f = p["w1"] * p["s1"]                                      # (4, 16) BN1 scale folded
    w1_big = jnp.zeros((PN_W, W1_COLS), jnp.float32)
    w2_big = jnp.zeros((W1_COLS, 9), jnp.float32)
    for k in range(9):
        w1_big = w1_big.at[k * PN_C:k * PN_C + META_C,
                           k * IN_C:(k + 1) * IN_C].add(w1f)
        w1_big = w1_big.at[4 * PN_C:4 * PN_C + META_C,           # subtract center tap p0
                           k * IN_C:(k + 1) * IN_C].add(-w1f)
        w2_big = w2_big.at[k * IN_C:(k + 1) * IN_C, k].set(p["w2"][:, 0])
    # pn9 lane 4 is a constant-one channel: it carries the BN1 shift and produces the
    # constant-one h1 column (lane 144) that in turn carries the weight_mlp2 bias.
    w1_big = w1_big.at[4, :H1_W].set(jnp.tile(p["sh1"][0], 9))
    w1_big = w1_big.at[4, H1_W].set(1.0)
    w2_big = w2_big.at[H1_W, :].set(p["b2"][0, 0])
    e_mat = jnp.repeat(jnp.eye(9, dtype=jnp.float32), IN_C, axis=1)   # (9, 144)
    return dict(w1_big=w1_big, w2_big=w2_big, e_mat=e_mat,
                wagg_f=p["wagg"] * p["s2"],                      # (144, 32) BN2 scale folded
                sh2=p["sh2"])                                    # (1, 32) BN2 shift


# --------------------------------- wrapper ---------------------------------------------
def _unfold3x3_nhwc(x, dilation):
    """im2col for kernel_size=3, padding=dilation, stride=1 on an NHWC tensor.
    x: (B,H,W,C) -> (B,H,W,9,C); tap order matches torch.nn.Unfold (row-major)."""
    b, h, w, c = x.shape
    xp = jnp.pad(x, ((0, 0), (dilation, dilation), (dilation, dilation), (0, 0)))
    taps = [xp[:, ki * dilation:ki * dilation + h, kj * dilation:kj * dilation + w, :]
            for ki in range(3) for kj in range(3)]
    return jnp.stack(taps, axis=3)


def meta_kernel_forward(x, mask, fp):
    """x: (B, 4+IN_C, H, W) NCHW, mask: (B, 1, H, W). Returns (B, OUT_C, H, W)."""
    b, c, h, w = x.shape
    assert (b, c, h, w) == (B, META_C + IN_C, H, W)

    # Wrapper im2col -> three lane-dense, start-aligned slabs (no in-kernel relayout).
    x_nhwc = jnp.transpose(x.astype(jnp.float32), (0, 2, 3, 1))          # (B,H,W,20)
    m_nhwc = jnp.transpose(mask.astype(jnp.float32), (0, 2, 3, 1))       # (B,H,W,1)
    u = _unfold3x3_nhwc(x_nhwc, DILATION)                                # (B,H,W,9,20)
    mu = _unfold3x3_nhwc(m_nhwc, DILATION)                               # (B,H,W,9,1)
    feat9 = u[..., META_C:].reshape(N_PIX, H1_W)                         # (512, 144)
    mask9 = mu.reshape(N_PIX, 9)                                         # (512, 9)
    pn = u[..., :META_C]                                                 # (B,H,W,9,4)
    pn9 = jnp.pad(pn, ((0, 0),) * 4 + ((0, PN_C - META_C),)).reshape(N_PIX, PN_W)
    pn9 = pn9.at[:, META_C].set(1.0)                                     # bias channel

    grid = (N_PIX // ROW_BLOCK,)

    def row_spec(cdim):
        return pl.BlockSpec((ROW_BLOCK, cdim), lambda i: (i, 0))

    def full_spec(shp):
        return pl.BlockSpec(shp, lambda i: (0, 0))

    out_flat = pl.pallas_call(
        _meta_kernel_body,
        out_shape=jax.ShapeDtypeStruct((N_PIX, OUT_C), jnp.float32),
        grid=grid,
        in_specs=[
            row_spec(PN_W),                    # pn9
            row_spec(H1_W),                    # feat9
            row_spec(9),                       # mask9
            full_spec((PN_W, W1_COLS)),        # w1_big (BN1 scale/shift + pn-p0 folded)
            full_spec((W1_COLS, 9)),           # w2_big (mlp2 bias folded)
            full_spec((9, H1_W)),              # attention expansion matrix
            full_spec((H1_W, OUT_C)),          # aggregation_mlp (BN2 scale folded)
            full_spec((1, OUT_C)),             # BN2 shift
        ],
        out_specs=row_spec(OUT_C),
        compiler_params=pltpu.CompilerParams(
            dimension_semantics=("parallel",),
        ),
    )(pn9, feat9, mask9, fp["w1_big"], fp["w2_big"], fp["e_mat"],
      fp["wagg_f"], fp["sh2"])

    # nn.Fold(feature_map_size, kernel_size=1) == reshape back to NCHW
    return out_flat.reshape(b, h, w, OUT_C).transpose(0, 3, 1, 2)


# ----------------------------- pure-JAX reference --------------------------------------
def reference_forward(x, mask, p):
    """Pure-JAX reference mirroring MetaKernel.forward_v1 (eval-mode BN)."""
    b, c, h, w = x.shape
    u = _unfold3x3_nhwc(jnp.transpose(x.astype(jnp.float32), (0, 2, 3, 1)), DILATION)
    mu = _unfold3x3_nhwc(jnp.transpose(mask.astype(jnp.float32), (0, 2, 3, 1)), DILATION)
    u = u.reshape(b, h * w, 9, c)
    mu = mu.reshape(b, h * w, 9, 1)
    feat = u[..., META_C:]
    pn = u[..., :META_C]
    p0 = pn[:, :, 4:5, :]
    d = pn - p0
    wts = jnp.einsum("bnkm,mc->bnkc", d, p["w1"], precision="highest")
    wts = jnp.maximum(wts * p["s1"] + p["sh1"], 0.0)
    wts = jnp.einsum("bnkc,co->bnko", wts, p["w2"], precision="highest") + p["b2"][0, 0]
    wts = wts * mu
    attn = jax.nn.softmax(wts[..., 0], axis=-1)[..., None]
    fu = (attn * feat).reshape(b, h * w, 9 * IN_C)
    fu = jnp.einsum("bnc,co->bno", fu, p["wagg"], precision="highest")
    fu = jnp.maximum(fu * p["s2"] + p["sh2"], 0.0)
    return fu.reshape(b, h, w, OUT_C).transpose(0, 3, 1, 2)


def init_params(key):
    ks = jax.random.split(key, 12)
    w1 = jax.random.normal(ks[0], (META_C, IN_C), jnp.float32) * 0.2
    g1 = jax.random.uniform(ks[1], (IN_C,), jnp.float32, 0.5, 1.5)
    be1 = jax.random.normal(ks[2], (IN_C,), jnp.float32) * 0.1
    mu1 = jax.random.normal(ks[3], (IN_C,), jnp.float32) * 0.1
    v1 = jax.random.uniform(ks[4], (IN_C,), jnp.float32, 0.5, 1.5)
    w2 = jax.random.normal(ks[5], (IN_C, 1), jnp.float32) * 0.2
    b2 = jax.random.normal(ks[6], (1, 1), jnp.float32) * 0.1
    wagg = jax.random.normal(ks[7], (9 * IN_C, OUT_C), jnp.float32) * 0.1
    g2 = jax.random.uniform(ks[8], (OUT_C,), jnp.float32, 0.5, 1.5)
    be2 = jax.random.normal(ks[9], (OUT_C,), jnp.float32) * 0.1
    mu2 = jax.random.normal(ks[10], (OUT_C,), jnp.float32) * 0.1
    v2 = jax.random.uniform(ks[11], (OUT_C,), jnp.float32, 0.5, 1.5)

    s1 = (g1 / jnp.sqrt(v1 + BN_EPS)).reshape(1, IN_C)
    sh1 = (be1 - mu1 * g1 / jnp.sqrt(v1 + BN_EPS)).reshape(1, IN_C)
    s2 = (g2 / jnp.sqrt(v2 + BN_EPS)).reshape(1, OUT_C)
    sh2 = (be2 - mu2 * g2 / jnp.sqrt(v2 + BN_EPS)).reshape(1, OUT_C)
    return dict(w1=w1, s1=s1, sh1=sh1, w2=w2, b2=b2, wagg=wagg, s2=s2, sh2=sh2)


if __name__ == "__main__":
    key = jax.random.PRNGKey(0)
    kp, kx, km = jax.random.split(key, 3)
    params = init_params(kp)
    fused = fuse_params(params)

    # x carries 4 meta (coordinate) channels + IN_C feature channels, NCHW.
    x = jax.random.normal(kx, (B, META_C + IN_C, H, W), jnp.float32)
    mask = (jax.random.uniform(km, (B, 1, H, W)) > 0.3).astype(jnp.float32)

    fwd = jax.jit(meta_kernel_forward)
    out = jax.block_until_ready(fwd(x, mask, fused))
    ref = jax.block_until_ready(reference_forward(x, mask, params))

    max_err = float(jnp.max(jnp.abs(out - ref)))
    if not (out.shape == (B, OUT_C, H, W) and max_err < 1e-2):
        raise AssertionError(f"mismatch: shape={out.shape}, max_err={max_err}")
    print("KERNEL_OK")
</pallas_src>

<mosaic_0001>
module attributes {stable_mosaic.version = 11 : i64} {
  func.func @_meta_kernel_body(%arg0: i32, %arg1: memref<256x72xf32, #tpu.memory_space<vmem>>, %arg2: memref<256x144xf32, #tpu.memory_space<vmem>>, %arg3: memref<256x9xf32, #tpu.memory_space<vmem>>, %arg4: memref<72x160xf32, #tpu.memory_space<vmem>>, %arg5: memref<160x9xf32, #tpu.memory_space<vmem>>, %arg6: memref<9x144xf32, #tpu.memory_space<vmem>>, %arg7: memref<144x32xf32, #tpu.memory_space<vmem>>, %arg8: memref<1x32xf32, #tpu.memory_space<vmem>>, %arg9: memref<256x32xf32, #tpu.memory_space<vmem>>) attributes {dimension_semantics = [#tpu.dimension_semantics<parallel>], iteration_bounds = array<i64: 2>, scalar_prefetch = 0 : i64, scratch_operands = 0 : i64, tpu.core_type = #tpu.core_type<tc>, window_params = [{transform_indices = @transform_0, window_bounds = array<i64: 256, 72>}, {transform_indices = @transform_1, window_bounds = array<i64: 256, 144>}, {transform_indices = @transform_2, window_bounds = array<i64: 256, 9>}, {pipeline_mode = #tpu.pipeline_mode<synchronous>, transform_indices = @transform_3, window_bounds = array<i64: 72, 160>}, {pipeline_mode = #tpu.pipeline_mode<synchronous>, transform_indices = @transform_4, window_bounds = array<i64: 160, 9>}, {pipeline_mode = #tpu.pipeline_mode<synchronous>, transform_indices = @transform_5, window_bounds = array<i64: 9, 144>}, {pipeline_mode = #tpu.pipeline_mode<synchronous>, transform_indices = @transform_6, window_bounds = array<i64: 144, 32>}, {pipeline_mode = #tpu.pipeline_mode<synchronous>, transform_indices = @transform_7, window_bounds = array<i64: 1, 32>}, {transform_indices = @transform_8, window_bounds = array<i64: 256, 32>}]} {
    %c0 = arith.constant 0 : index
    %c0_0 = arith.constant 0 : index
    %0 = vector.load %arg1[%c0, %c0_0] : memref<256x72xf32, #tpu.memory_space<vmem>>, vector<256x72xf32>
    %c0_1 = arith.constant 0 : index
    %c0_2 = arith.constant 0 : index
    %1 = vector.load %arg4[%c0_1, %c0_2] : memref<72x160xf32, #tpu.memory_space<vmem>>, vector<72x160xf32>
    %cst = arith.constant dense<0.000000e+00> : vector<256x160xf32>
    %2 = tpu.matmul %0, %1, %cst {dimension_numbers = #tpu.dot_dimension_numbers<[1], [0], [0], [1], [0, 0, 1, 1], [], []>} : vector<256x72xf32>, vector<72x160xf32>, vector<256x160xf32> -> vector<256x160xf32>
    %cst_3 = arith.constant 0.000000e+00 : f32
    %3 = vector.broadcast %cst_3 : f32 to vector<256x160xf32>
    %4 = arith.maximumf %2, %3 : vector<256x160xf32>
    %c0_4 = arith.constant 0 : index
    %c0_5 = arith.constant 0 : index
    %5 = vector.load %arg5[%c0_4, %c0_5] : memref<160x9xf32, #tpu.memory_space<vmem>>, vector<160x9xf32>
    %cst_6 = arith.constant dense<0.000000e+00> : vector<256x9xf32>
    %6 = tpu.matmul %4, %5, %cst_6 {dimension_numbers = #tpu.dot_dimension_numbers<[1], [0], [0], [1], [0, 0, 1, 1], [], []>} : vector<256x160xf32>, vector<160x9xf32>, vector<256x9xf32> -> vector<256x9xf32>
    %c0_7 = arith.constant 0 : index
    %c0_8 = arith.constant 0 : index
    %7 = vector.load %arg3[%c0_7, %c0_8] : memref<256x9xf32, #tpu.memory_space<vmem>>, vector<256x9xf32>
    %8 = arith.mulf %6, %7 : vector<256x9xf32>
    %cst_9 = arith.constant dense<0xFF800000> : vector<256xf32>
    %9 = vector.multi_reduction <maximumf>, %8, %cst_9 [1] : vector<256x9xf32> to vector<256xf32>
    %10 = vector.shape_cast %9 : vector<256xf32> to vector<256x1xf32>
    %11 = vector.broadcast %10 : vector<256x1xf32> to vector<256x9xf32>
    %12 = arith.subf %8, %11 : vector<256x9xf32>
    %13 = math.exp %12 : vector<256x9xf32>
    %cst_10 = arith.constant dense<0.000000e+00> : vector<256xf32>
    %14 = vector.multi_reduction <add>, %13, %cst_10 [1] : vector<256x9xf32> to vector<256xf32>
    %15 = vector.shape_cast %14 : vector<256xf32> to vector<256x1xf32>
    %16 = tpu.reciprocal %15 {approx = true} : vector<256x1xf32> -> vector<256x1xf32>
    %17 = vector.broadcast %16 : vector<256x1xf32> to vector<256x9xf32>
    %18 = arith.mulf %13, %17 : vector<256x9xf32>
    %c0_11 = arith.constant 0 : index
    %c0_12 = arith.constant 0 : index
    %19 = vector.load %arg6[%c0_11, %c0_12] : memref<9x144xf32, #tpu.memory_space<vmem>>, vector<9x144xf32>
    %cst_13 = arith.constant dense<0.000000e+00> : vector<256x144xf32>
    %20 = tpu.matmul %18, %19, %cst_13 {dimension_numbers = #tpu.dot_dimension_numbers<[1], [0], [0], [1], [0, 0, 1, 1], [], []>} : vector<256x9xf32>, vector<9x144xf32>, vector<256x144xf32> -> vector<256x144xf32>
    %c0_14 = arith.constant 0 : index
    %c0_15 = arith.constant 0 : index
    %21 = vector.load %arg2[%c0_14, %c0_15] : memref<256x144xf32, #tpu.memory_space<vmem>>, vector<256x144xf32>
    %22 = arith.mulf %21, %20 : vector<256x144xf32>
    %c0_16 = arith.constant 0 : index
    %c0_17 = arith.constant 0 : index
    %23 = vector.load %arg7[%c0_16, %c0_17] : memref<144x32xf32, #tpu.memory_space<vmem>>, vector<144x32xf32>
    %cst_18 = arith.constant dense<0.000000e+00> : vector<256x32xf32>
    %24 = tpu.matmul %22, %23, %cst_18 {dimension_numbers = #tpu.dot_dimension_numbers<[1], [0], [0], [1], [0, 0, 1, 1], [], []>} : vector<256x144xf32>, vector<144x32xf32>, vector<256x32xf32> -> vector<256x32xf32>
    %c0_19 = arith.constant 0 : index
    %c0_20 = arith.constant 0 : index
    %25 = vector.load %arg8[%c0_19, %c0_20] : memref<1x32xf32, #tpu.memory_space<vmem>>, vector<1x32xf32>
    %26 = vector.broadcast %25 : vector<1x32xf32> to vector<256x32xf32>
    %27 = arith.addf %24, %26 : vector<256x32xf32>
    %cst_21 = arith.constant 0.000000e+00 : f32
    %28 = vector.broadcast %cst_21 : f32 to vector<256x32xf32>
    %29 = arith.maximumf %27, %28 : vector<256x32xf32>
    %c0_22 = arith.constant 0 : index
    %c0_23 = arith.constant 0 : index
    %30 = vector.load %arg9[%c0_22, %c0_23] : memref<256x32xf32, #tpu.memory_space<vmem>>, vector<256x32xf32>
    tpu.vector_store %arg9[%c0_22, %c0_23], %29 {strides = array<i32>} : memref<256x32xf32, #tpu.memory_space<vmem>>, vector<256x32xf32>,
    return
  }
  func.func @transform_0(%arg0: i32) -> (i32, i32) {
    %c0_i32 = arith.constant 0 : i32
    %c0_i32_0 = arith.constant 0 : i32
    return %arg0, %c0_i32 : i32, i32
  }
  func.func @transform_1(%arg0: i32) -> (i32, i32) {
    %c0_i32 = arith.constant 0 : i32
    %c0_i32_0 = arith.constant 0 : i32
    return %arg0, %c0_i32 : i32, i32
  }
  func.func @transform_2(%arg0: i32) -> (i32, i32) {
    %c0_i32 = arith.constant 0 : i32
    %c0_i32_0 = arith.constant 0 : i32
    return %arg0, %c0_i32 : i32, i32
  }
  func.func @transform_3(%arg0: i32) -> (i32, i32) {
    %c0_i32 = arith.constant 0 : i32
    %c0_i32_0 = arith.constant 0 : i32
    %c0_i32_1 = arith.constant 0 : i32
    return %c0_i32, %c0_i32_0 : i32, i32
  }
  func.func @transform_4(%arg0: i32) -> (i32, i32) {
    %c0_i32 = arith.constant 0 : i32
    %c0_i32_0 = arith.constant 0 : i32
    %c0_i32_1 = arith.constant 0 : i32
    return %c0_i32, %c0_i32_0 : i32, i32
  }
  func.func @transform_5(%arg0: i32) -> (i32, i32) {
    %c0_i32 = arith.constant 0 : i32
    %c0_i32_0 = arith.constant 0 : i32
    %c0_i32_1 = arith.constant 0 : i32
    return %c0_i32, %c0_i32_0 : i32, i32
  }
  func.func @transform_6(%arg0: i32) -> (i32, i32) {
    %c0_i32 = arith.constant 0 : i32
    %c0_i32_0 = arith.constant 0 : i32
    %c0_i32_1 = arith.constant 0 : i32
    return %c0_i32, %c0_i32_0 : i32, i32
  }
  func.func @transform_7(%arg0: i32) -> (i32, i32) {
    %c0_i32 = arith.constant 0 : i32
    %c0_i32_0 = arith.constant 0 : i32
    %c0_i32_1 = arith.constant 0 : i32
    return %c0_i32, %c0_i32_0 : i32, i32
  }
  func.func @transform_8(%arg0: i32) -> (i32, i32) {
    %c0_i32 = arith.constant 0 : i32
    %c0_i32_0 = arith.constant 0 : i32
    return %arg0, %c0_i32 : i32, i32
  }
}

</mosaic_0001>

<bundles_post_ra>
// kernel: meta_kernel_forward.1
= control target key start
LH: loop header
LB: loop body
LE: loop exit
PB: predicated region body
PF: predicated region fallthrough
CT: control target
= control target key end

     0   :  { %13 = vsyncpa [#allocation3], 0  ;;  %s4162_s0 = inlined_call_operand.vmem [shape: f32[512,72], index: 0, kind: input, shape index: {}]   ;;  %s4163_s1 = inlined_call_operand.vmem [shape: f32[512,144], index: 1, kind: input, shape index: {}]   ;;  %s4164_s2 = inlined_call_operand.vmem [shape: f32[512,9], index: 2, kind: input, shape index: {}]   ;;  %s4165_s3 = inlined_call_operand.vmem [shape: f32[72,160], index: 3, kind: input, shape index: {}]   ;;  %s4166_s4 = inlined_call_operand.vmem [shape: f32[160,9], index: 4, kind: input, shape index: {}]   ;;  %s4167_s5 = inlined_call_operand.vmem [shape: f32[9,144], index: 5, kind: input, shape index: {}]   ;;  %s4168_s6 = inlined_call_operand.vmem [shape: f32[144,32], index: 6, kind: input, shape index: {}]   ;;  %s4169_s7 = inlined_call_operand.vmem [shape: f32[1,32], index: 7, kind: input, shape index: {}]   ;;  %s4170_s8 = inlined_call_operand.hbm [shape: f32[512,32], index: 8, kind: output, shape index: {}]  }
   0x1   :  { %15 = vsyncpa [#allocation3 + $0x1], 0  ;;  %s3055_s27 = smov 0   ;;  %s3057_s28 = smov 0  }
   0x2   :  { %s3059_s29 = smov 0   ;;  %s3061_s30 = smov 0  }
   0x3 LB: > { %s3076_s9 = sadd.s32 4294967295, %s3004_s30   ;;  %s2584_s10 = sadd.s32 4294967294, %s3004_s30   ;;  %s3004_s30 = sphi %s3061_s30, %s4176_s30   ;;  %s3000_s29 = sphi %s3059_s29, %s4175_s29   ;;  %s2996_s28 = sphi %s3057_s28, %s4174_s28   ;;  %s2992_s27 = sphi %s3055_s27, %s4173_s27  }
   0x4   : > { %s3080_s11 = sadd.s32 1, %s3004_s30   ;;  %s211_s12 = sadd.s32 1, %s3000_s29 }
   0x5   : > { %s208_s13 = ssub.s32 %s3004_s30, %s3080_s11  ;;  %p221_p0 = scmp.ne.s32.totalorder %s3000_s29, %s2996_s28 }
   0x6   : > { %p209_p1 = scmp.eq.s32.totalorder %s208_s13, 0  ;;  %p222_p2 = scmp.eq.s32.totalorder %s3076_s9, 1 }
   0x7   : > { %p227_p3 = scmp.ne.s32.totalorder %s2996_s28, %s2992_s27  ;;  %p228_p4 = scmp.eq.s32.totalorder %s2584_s10, 1 }
   0x8   : > { %s3091_s14 = scalar_select %p209_p1, %s3000_s29, %s211_s12  }
   0x9   : > { %p3093_p5 = por %p222_p2, %p221_p0  ;;  %p3097_p6 = por %p228_p4, %p227_p3 }
   0xa   : > { %p2587_p7 = scmp.ge.s32.totalorder %s3004_s30, 1  ;;  %p289_p8 = scmp.lt.s32.totalorder %s3004_s30, 3 }
   0xc   : > { %p290_p9 = pnand %p2587_p7, %p289_p8 }
   0xd   : > { %s2589_s23 = sshll.u32 (!%p290_p9), %s3076_s9, 5  ;;  %s2733_s12 = sshll.u32 (!%p290_p9), %s3076_s9, 12 }
   0xe   : > { %293 = sbr.rel (%p290_p9) target bundleno = 1276 (0x4fc), region = 52  ;;  %p335_p10 = scmp.lt.s32.totalorder (!%p290_p9), %s2589_s23, 63 }
   0xf   : > { %s3007_s20 = smov (!%p290_p9), [#allocation2]  }
  0x13   : > { %v403_v0 = vld [vmem:[%s4165_s3 + $0x88] sm:$0xff]  ;;  %v402_v1 = vld [vmem:[%s4165_s3 + $0x80] sm:$0xff]  ;;  %v401_v2 = vld [vmem:[%s4165_s3 + $0x78] sm:$0xff]  ;;  %v3006_v4 = vmov 0.0   ;;  %s4178_s23 = smov (!%p335_p10, %s2589_s23), 63  ;;  %vm404_vm0 = vcmask 588800  }
  0x14   : > { %515 = vmatprep.subr.mxu0 %v403_v0  ;;  %v400_v3 = vld [vmem:[%s4165_s3 + $0x70] sm:$0xff]  ;;  %565 = vmatprep.mubr.f32.mxu0 %v3006_v4  ;;  %v399_v5 = vld [vmem:[%s4165_s3 + $0x68] sm:$0xff]  ;;  %v398_v6 = vld [vmem:[%s4165_s3 + $0x60] sm:$0xff]  ;;  %s2590_s24 = sshll.u32 %s4178_s23, 3  ;;  %vm842_vm1 = vcmask 261120   ;;  %vm1228_vm2 = vcmask 72704  }
  0x15   : > { %516 = vmatpush1.msra.mxu0 %v402_v1  ;;  %2734 = vmatprep.subr.mxu1 %v3006_v4  ;;  %v397_v7 = vld [vmem:[%s4165_s3 + $0x58] sm:$0xff]  ;;  %v396_v8 = vld [vmem:[%s4165_s3 + $0x50] sm:$0xff]  ;;  %v395_v9 = vld [vmem:[%s4165_s3 + $0x48] sm:$0xff]  ;;  %s3174_s22 = scalar_lea.vmem %s4162_s0, %s2590_s24  ;;  %s3403_s21 = scalar_lea.vmem %s4164_s2, %s2590_s24  ;;  %vm1681_vm3 = vcmask 1040384   ;;  %vm2098_vm4 = vcmask 130048  }
  0x16   : > { %517 = vmatprep.subr.mxu0 %v401_v2  ;;  %v837_v10 = vld [vmem:[%s4166_s4 + $0x78] sm:$0xff]  ;;  %v394_v11 = vld [vmem:[%s4165_s3 + $0x40] sm:$0xff]  ;;  %v836_v13 = vld [vmem:[%s4166_s4 + $0x70] sm:$0xff]  ;;  %s2732_s19 = sshll.u32 %s4178_s23, 4  ;;  %s331_s23 = sand.u32 1, %s2996_s28  }
  0x17   : > { %518 = vmatpush1.msra.mxu0 %v400_v3  ;;  %2754 = vmatpush1.msra.mxu1 %v837_v10  ;;  %v393_v12 = vld [vmem:[%s4165_s3 + $0x38] sm:$0xff]  ;;  %v392_v14 = vld [vmem:[%s4165_s3 + $0x30] sm:$0xff]  ;;  %v391_v15 = vld [vmem:[%s4165_s3 + $0x28] sm:$0xff]  ;;  %s2588_s26 = sshll.u32 %s331_s23, 8  ;;  %s4122_s9 = scalar_lea.sflag [#allocation3], %s331_s23 }
  0x18   : > { %519 = vmatprep.subr.mxu0 %v399_v5  ;;  %2735 = vmatprep.subr.mxu1 %v3006_v4  ;;  %v835_v16 = vld [vmem:[%s4166_s4 + $0x68] sm:$0xff]  ;;  %v390_v17 = vld [vmem:[%s4165_s3 + $0x20] sm:$0xff]  ;;  %v389_v18 = vld [vmem:[%s4165_s3 + $0x18] sm:$0xff]  ;;  %s4014_s10 = scalar_lea.vmem [#allocation2], %s2588_s26 }
  0x19   : > { %520 = vmatpush1.msra.mxu0 %v398_v6  ;;  %2755 = vmatpush1.msra.mxu1 %v836_v13  ;;  %v388_v19 = vld [vmem:[%s4165_s3 + $0x10] sm:$0xff]  ;;  %v387_v20 = vld [vmem:[%s4165_s3 + $0x8] sm:$0xff]  ;;  %v834_v21 = vld [vmem:[%s4166_s4 + $0x60] sm:$0xff]  ;;  %s2498_s13 = sshll.u32 %s4014_s10, 4  ;;  %s4116_s13 = int_to_ptr.vmem [resolvable:$true] %s2498_s13 }
  0x1a   : > { %521 = vmatprep.subr.mxu0 %v397_v7  ;;  %2736 = vmatprep.subr.mxu1 %v3006_v4  ;;  %v386_v22 = vld [vmem:[%s4165_s3] sm:$0xff]  ;;  %v833_v24 = vld [vmem:[%s4166_s4 + $0x58] sm:$0xff]  ;;  %v355_v25 = vld [vmem:[%s3174_s22 + $0x8] sm:$0xff] }
  0x1b   : > { %522 = vmatpush1.msra.mxu0 %v396_v8  ;;  %2756 = vmatpush1.msra.mxu1 %v835_v16  ;;  %v354_v23 = vld [vmem:[%s3174_s22] sm:$0xff]  ;;  %v832_v26 = vld [vmem:[%s4166_s4 + $0x50] sm:$0xff]  ;;  %v831_v28 = vld [vmem:[%s4166_s4 + $0x48] sm:$0xff] }
  0x1c   : > { %523 = vmatprep.subr.mxu0 %v395_v9  ;;  %2737 = vmatprep.subr.mxu1 %v3006_v4  ;;  %v356_v27 = vld [vmem:[%s3174_s22 + $0x10] sm:$0xff]  ;;  %v357_v29 = vld [vmem:[%s3174_s22 + $0x18] sm:$0xff]  ;;  %v830_v30 = vld [vmem:[%s4166_s4 + $0x40] sm:$0xff] }
  0x1d   : > { %524 = vmatpush1.msra.mxu0 %v394_v11  ;;  %2757 = vmatpush1.msra.mxu1 %v834_v21  ;;  %v358_v31 = vld [vmem:[%s3174_s22 + $0x20] sm:$0xff]  ;;  %v829_v32 = vld [vmem:[%s4166_s4 + $0x38] sm:$0xff]  ;;  %v828_v33 = vld [vmem:[%s4166_s4 + $0x30] sm:$0xff] }
  0x1e   : > { %525 = vmatprep.subr.mxu0 %v393_v12  ;;  %2738 = vmatprep.subr.mxu1 %v3006_v4  ;;  %v359_v34 = vld [vmem:[%s3174_s22 + $0x28] sm:$0xff]  ;;  %v826_v36 = vld [vmem:[%s4166_s4 + $0x20] sm:$0xff]  ;;  %v360_v37 = vld [vmem:[%s3174_s22 + $0x30] sm:$0xff] }
  0x1f   : > { %526 = vmatpush1.msra.mxu0 %v392_v14  ;;  %2758 = vmatpush1.msra.mxu1 %v833_v24  ;;  %v827_v35 = vld [vmem:[%s4166_s4 + $0x28] sm:$0xff]  ;;  %v825_v38 = vld [vmem:[%s4166_s4 + $0x18] sm:$0xff]  ;;  %v824_v39 = vld [vmem:[%s4166_s4 + $0x10] sm:$0xff] }
  0x20   : > { %527 = vmatprep.subr.mxu0 %v391_v15  ;;  %2739 = vmatprep.subr.mxu1 %v3006_v4  ;;  %v361_v40 = vld [vmem:[%s3174_s22 + $0x38] sm:$0xff]  ;;  %v823_v41 = vld [vmem:[%s4166_s4 + $0x8] sm:$0xff]  ;;  %v822_v42 = vld [vmem:[%s4166_s4] sm:$0xff] }
  0x21   : > { %528 = vmatpush1.msra.mxu0 %v390_v17  ;;  %2759 = vmatpush1.msra.mxu1 %v832_v26  ;;  %v362_v43 = vld [vmem:[%s3174_s22 + $0x40] sm:$0xff]  ;;  %v841_v44 = vld [vmem:[%s4166_s4 + $0x98] sm:$0xff]  ;;  %v840_v45 = vld [vmem:[%s4166_s4 + $0x90] sm:$0xff] }
  0x22   : > { %529 = vmatprep.subr.mxu0 %v389_v18  ;;  %2740 = vmatprep.subr.mxu1 %v3006_v4  ;;  %v363_v46 = vld [vmem:[%s3174_s22 + $0x48] sm:$0xff]  ;;  %v364_v48 = vld [vmem:[%s3174_s22 + $0x50] sm:$0xff]  ;;  %v365_v49 = vld [vmem:[%s3174_s22 + $0x58] sm:$0xff] }
  0x23   : > { %530 = vmatpush1.msra.mxu0 %v388_v19  ;;  %2760 = vmatpush1.msra.mxu1 %v831_v28  ;;  %v839_v47 = vld [vmem:[%s4166_s4 + $0x88] sm:$0xff]  ;;  %v366_v50 = vld [vmem:[%s3174_s22 + $0x60] sm:$0xff]  ;;  %v368_v52 = vld [vmem:[%s3174_s22 + $0x70] sm:$0xff] }
  0x24   : > { %531 = vmatprep.subr.mxu0 %v387_v20  ;;  %2741 = vmatprep.subr.mxu1 %v3006_v4  ;;  %v367_v51 = vld [vmem:[%s3174_s22 + $0x68] sm:$0xff]  ;;  %v369_v53 = vld [vmem:[%s3174_s22 + $0x78] sm:$0xff]  ;;  %v370_v54 = vld [vmem:[%s3174_s22 + $0x80] sm:$0xff] }
  0x25   : > { %532 = vmatpush1.msra.mxu0 %v386_v22  ;;  %2761 = vmatpush1.msra.mxu1 %v830_v30  ;;  %v371_v55 = vld [vmem:[%s3174_s22 + $0x88] sm:$0xff]  ;;  %v838_v56 = vld [vmem:[%s4166_s4 + $0x80] sm:$0xff]  ;;  %v372_v57 = vld [vmem:[%s3174_s22 + $0x90] sm:$0xff] }
  0x26   : > { %2596 = vmatmul.mubr.msk.f32.vlgmr.msra.gmra.mxu0 %vm404_vm0, %v354_v23  ;;  %939 = vmatprep.subr.mxu0 %v3006_v4  ;;  %v373_v58 = vld [vmem:[%s3174_s22 + $0x98] sm:$0xff]  ;;  %v374_v59 = vld [vmem:[%s3174_s22 + $0xa0] sm:$0xff]  ;;  %v375_v60 = vld [vmem:[%s3174_s22 + $0xa8] sm:$0xff] }
  0x27   : > { %571 = vmatprep.mubr.f32.mxu0 %v3006_v4  ;;  %940 = vmatpush1.msra.mxu0 %v837_v10  ;;  %v376_v61 = vld [vmem:[%s3174_s22 + $0xb0] sm:$0xff]  ;;  %v377_v62 = vld [vmem:[%s3174_s22 + $0xb8] sm:$0xff]  ;;  %v378_v63 = vld [vmem:[%s3174_s22 + $0xc0] sm:$0xff] }
  0x28   : > { %941 = vmatprep.subr.mxu0 %v3006_v4  ;;  %2742 = vmatprep.subr.mxu1 %v3006_v4  ;;  %v379_v0 = vld [vmem:[%s3174_s22 + $0xc8] sm:$0xff]  ;;  %v380_v1 = vld [vmem:[%s3174_s22 + $0xd0] sm:$0xff]  ;;  %v381_v2 = vld [vmem:[%s3174_s22 + $0xd8] sm:$0xff] }
  0x29   : > { %942 = vmatpush1.msra.mxu0 %v836_v13  ;;  %2762 = vmatpush1.msra.mxu1 %v829_v32  ;;  %v382_v3 = vld [vmem:[%s3174_s22 + $0xe0] sm:$0xff]  ;;  %v383_v5 = vld [vmem:[%s3174_s22 + $0xe8] sm:$0xff]  ;;  %v384_v6 = vld [vmem:[%s3174_s22 + $0xf0] sm:$0xff] }
  0x2a   : > { %2597 = vmatmul.mubr.msk.f32.gmra.mxu0 %vm404_vm0, %v355_v25  ;;  %943 = vmatprep.subr.mxu0 %v3006_v4  ;;  %v385_v7 = vld [vmem:[%s3174_s22 + $0xf8] sm:$0xff]  ;;  %s2944_s22 = scalar_lea.vmem %s4116_s13, 4096 }
  0x2b   : > { %577 = vmatprep.mubr.f32.mxu0 %v3006_v4  ;;  %944 = vmatpush1.msra.mxu0 %v835_v16  ;;  %p2945_p11 = scmp.ne.s32.totalorder %s4116_s13, %s2944_s22 }
  0x2c   : > { %945 = vmatprep.subr.mxu0 %v3006_v4  ;;  %2743 = vmatprep.subr.mxu1 %v3006_v4 }
  0x2d   : > { %946 = vmatpush1.msra.mxu0 %v834_v21  ;;  %2763 = vmatpush1.msra.mxu1 %v828_v33  ;;  %p2946_p12 = pnand %p2945_p11, %p3093_p5 }
  0x2e   : > { %2598 = vmatmul.mubr.msk.f32.gmra.mxu0 %vm404_vm0, %v356_v27  ;;  %947 = vmatprep.subr.mxu0 %v3006_v4 }
  0x2f   : > { %583 = vmatprep.mubr.f32.mxu0 %v3006_v4  ;;  %948 = vmatpush1.msra.mxu0 %v833_v24  ;;  %p2947_p13 = pneg %p2946_p12 }
  0x30   : > { %949 = vmatprep.subr.mxu0 %v3006_v4  ;;  %2744 = vmatprep.subr.mxu1 %v3006_v4 }
  0x31   : > { %950 = vmatpush1.msra.mxu0 %v832_v26  ;;  %2764 = vmatpush1.msra.mxu1 %v827_v35 }
  0x32   : > { %2599 = vmatmul.mubr.msk.f32.gmra.mxu0 %vm404_vm0, %v357_v29  ;;  %951 = vmatprep.subr.mxu0 %v3006_v4 }
  0x33   : > { %589 = vmatprep.mubr.f32.mxu0 %v3006_v4  ;;  %952 = vmatpush1.msra.mxu0 %v831_v28 }
  0x34   : > { %953 = vmatprep.subr.mxu0 %v3006_v4  ;;  %2745 = vmatprep.subr.mxu1 %v3006_v4 }
  0x35   : > { %954 = vmatpush1.msra.mxu0 %v830_v30  ;;  %2765 = vmatpush1.msra.mxu1 %v826_v36 }
  0x36   : > { %2600 = vmatmul.mubr.msk.f32.gmra.mxu0 %vm404_vm0, %v358_v31  ;;  %955 = vmatprep.subr.mxu0 %v3006_v4 }
  0x37   : > { %595 = vmatprep.mubr.f32.mxu0 %v3006_v4  ;;  %956 = vmatpush1.msra.mxu0 %v829_v32 }
  0x38   : > { %957 = vmatprep.subr.mxu0 %v3006_v4  ;;  %2746 = vmatprep.subr.mxu1 %v3006_v4 }
  0x39   : > { %958 = vmatpush1.msra.mxu0 %v828_v33  ;;  %2766 = vmatpush1.msra.mxu1 %v825_v38 }
  0x3a   : > { %2601 = vmatmul.mubr.msk.f32.gmra.mxu0 %vm404_vm0, %v359_v34  ;;  %959 = vmatprep.subr.mxu0 %v3006_v4 }
  0x3b   : > { %601 = vmatprep.mubr.f32.mxu0 %v3006_v4  ;;  %960 = vmatpush1.msra.mxu0 %v827_v35 }
  0x3c   : > { %961 = vmatprep.subr.mxu0 %v3006_v4  ;;  %2747 = vmatprep.subr.mxu1 %v3006_v4 }
  0x3d   : > { %962 = vmatpush1.msra.mxu0 %v826_v36  ;;  %2767 = vmatpush1.msra.mxu1 %v824_v39 }
  0x3e   : > { %2602 = vmatmul.mubr.msk.f32.gmra.mxu0 %vm404_vm0, %v360_v37  ;;  %963 = vmatprep.subr.mxu0 %v3006_v4 }
  0x3f   : > { %607 = vmatprep.mubr.f32.mxu0 %v3006_v4  ;;  %964 = vmatpush1.msra.mxu0 %v825_v38 }
  0x40   : > { %965 = vmatprep.subr.mxu0 %v3006_v4  ;;  %2748 = vmatprep.subr.mxu1 %v3006_v4 }
  0x41   : > { %966 = vmatpush1.msra.mxu0 %v824_v39  ;;  %2768 = vmatpush1.msra.mxu1 %v823_v41 }
  0x42   : > { %2603 = vmatmul.mubr.msk.f32.gmra.mxu0 %vm404_vm0, %v361_v40  ;;  %967 = vmatprep.subr.mxu0 %v3006_v4 }
  0x43   : > { %613 = vmatprep.mubr.f32.mxu0 %v3006_v4  ;;  %968 = vmatpush1.msra.mxu0 %v823_v41 }
  0x44   : > { %969 = vmatprep.subr.mxu0 %v3006_v4  ;;  %2749 = vmatprep.subr.mxu1 %v3006_v4 }
  0x45   : > { %970 = vmatpush1.msra.mxu0 %v822_v42  ;;  %2769 = vmatpush1.msra.mxu1 %v822_v42 }
  0x46   : > { %2604 = vmatmul.mubr.msk.f32.gmra.mxu0 %vm404_vm0, %v362_v43  ;;  %995 = vmatprep.subr.mxu0 %v3006_v4 }
  0x47   : > { %619 = vmatprep.mubr.f32.mxu0 %v3006_v4  ;;  %996 = vmatpush2.msra.mxu0 %v841_v44 }
  0x48   : > { %997 = vmatprep.subr.mxu0 %v3006_v4  ;;  %2750 = vmatprep.subr.mxu1 %v3006_v4 }
  0x49   : > { %998 = vmatpush2.msra.mxu0 %v840_v45  ;;  %2770 = vmatpush2.msra.mxu1 %v841_v44 }
  0x4a   : > { %2605 = vmatmul.mubr.msk.f32.gmra.mxu0 %vm404_vm0, %v363_v46  ;;  %999 = vmatprep.subr.mxu0 %v3006_v4 }
  0x4b   : > { %625 = vmatprep.mubr.f32.mxu0 %v3006_v4  ;;  %1000 = vmatpush2.msra.mxu0 %v839_v47 }
  0x4c   : > { %1001 = vmatprep.subr.mxu0 %v3006_v4  ;;  %2751 = vmatprep.subr.mxu1 %v3006_v4 }
  0x4d   : > { %2771 = vmatpush2.msra.mxu1 %v840_v45  ;;  %1002 = vmatpush2.msra.mxu0 %v838_v56 }
  0x4e   : > { %2606 = vmatmul.mubr.msk.f32.gmra.mxu0 %vm404_vm0, %v364_v48  ;;  %2752 = vmatprep.subr.mxu1 %v3006_v4 }
  0x4f   : > { %631 = vmatprep.mubr.f32.mxu0 %v3006_v4  ;;  %2772 = vmatpush2.msra.mxu1 %v839_v47 }
  0x50   : > { %2753 = vmatprep.subr.mxu1 %v3006_v4 }
  0x51   : > { %2773 = vmatpush2.msra.mxu1 %v838_v56 }
  0x52   : > { %2607 = vmatmul.mubr.msk.f32.gmra.mxu0 %vm404_vm0, %v365_v49  ;;  %2195 = vmatprep.subr.mxu1 %v3006_v4 }
  0x53   : > { %637 = vmatprep.mubr.f32.mxu0 %v3006_v4 }
  0x56   : > { %2608 = vmatmul.mubr.msk.f32.gmra.mxu0 %vm404_vm0, %v366_v50 }
  0x57   : > { %643 = vmatprep.mubr.f32.mxu0 %v3006_v4 }
  0x5a   : > { %2609 = vmatmul.mubr.msk.f32.gmra.mxu0 %vm404_vm0, %v367_v51 }
  0x5b   : > { %649 = vmatprep.mubr.f32.mxu0 %v3006_v4 }
  0x5e   : > { %2610 = vmatmul.mubr.msk.f32.gmra.mxu0 %vm404_vm0, %v368_v52 }
  0x5f   : > { %655 = vmatprep.mubr.f32.mxu0 %v3006_v4 }
  0x62   : > { %2611 = vmatmul.mubr.msk.f32.gmra.mxu0 %vm404_vm0, %v369_v53 }
  0x63   : > { %661 = vmatprep.mubr.f32.mxu0 %v3006_v4 }
  0x66   : > { %2612 = vmatmul.mubr.msk.f32.gmra.mxu0 %vm404_vm0, %v370_v54 }
  0x67   : > { %667 = vmatprep.mubr.f32.mxu0 %v3006_v4 }
  0x6a   : > { %2613 = vmatmul.mubr.msk.f32.gmra.mxu0 %vm404_vm0, %v371_v55 }
  0x6b   : > { %673 = vmatprep.mubr.f32.mxu0 %v3006_v4 }
  0x6e   : > { %2614 = vmatmul.mubr.msk.f32.gmra.mxu0 %vm404_vm0, %v372_v57 }
  0x6f   : > { %679 = vmatprep.mubr.f32.mxu0 %v3006_v4 }
  0x72   : > { %2615 = vmatmul.mubr.msk.f32.gmra.mxu0 %vm404_vm0, %v373_v58 }
  0x73   : > { %685 = vmatprep.mubr.f32.mxu0 %v3006_v4 }
  0x76   : > { %2616 = vmatmul.mubr.msk.f32.gmra.mxu0 %vm404_vm0, %v374_v59 }
  0x77   : > { %691 = vmatprep.mubr.f32.mxu0 %v3006_v4 }
  0x7a   : > { %2617 = vmatmul.mubr.msk.f32.gmra.mxu0 %vm404_vm0, %v375_v60 }
  0x7b   : > { %697 = vmatprep.mubr.f32.mxu0 %v3006_v4 }
  0x7e   : > { %2618 = vmatmul.mubr.msk.f32.gmra.mxu0 %vm404_vm0, %v376_v61 }
  0x7f   : > { %703 = vmatprep.mubr.f32.mxu0 %v3006_v4 }
  0x82   : > { %2619 = vmatmul.mubr.msk.f32.gmra.mxu0 %vm404_vm0, %v377_v62 }
  0x83   : > { %709 = vmatprep.mubr.f32.mxu0 %v3006_v4 }
  0x86   : > { %2620 = vmatmul.mubr.msk.f32.gmra.mxu0 %vm404_vm0, %v378_v63 }
  0x87   : > { %715 = vmatprep.mubr.f32.mxu0 %v3006_v4 }
  0x8a   : > { %2621 = vmatmul.mubr.msk.f32.gmra.mxu0 %vm404_vm0, %v379_v0 }
  0x8b   : > { %721 = vmatprep.mubr.f32.mxu0 %v3006_v4 }
  0x8e   : > { %2622 = vmatmul.mubr.msk.f32.gmra.mxu0 %vm404_vm0, %v380_v1 }
  0x8f   : > { %727 = vmatprep.mubr.f32.mxu0 %v3006_v4 }
  0x92   : > { %2623 = vmatmul.mubr.msk.f32.gmra.mxu0 %vm404_vm0, %v381_v2 }
  0x93   : > { %733 = vmatprep.mubr.f32.mxu0 %v3006_v4 }
  0x96   : > { %2624 = vmatmul.mubr.msk.f32.gmra.mxu0 %vm404_vm0, %v382_v3 }
  0x97   : > { %739 = vmatprep.mubr.f32.mxu0 %v3006_v4 }
  0x9a   : > { %2625 = vmatmul.mubr.msk.f32.gmra.mxu0 %vm404_vm0, %v383_v5 }
  0x9b   : > { %745 = vmatprep.mubr.f32.mxu0 %v3006_v4 }
  0x9e   : > { %2626 = vmatmul.mubr.msk.f32.gmra.mxu0 %vm404_vm0, %v384_v6 }
  0x9f   : > { %751 = vmatprep.mubr.f32.mxu0 %v3006_v4 }
  0xa2   : > { %2627 = vmatmul.mubr.msk.f32.gmra.mxu0 %vm404_vm0, %v385_v7 }
  0xe6   : > { %v567_v8 = vpop.f32.mrf.mxu0 }
  0xe7   : > { %v758_v11 = vmax.f32 %v567_v8, 0.0 }
  0xe8   : > { %v569_v9 = vpop.f32.mrf.mxu0 }
  0xe9   : > { %v759_v10 = vmax.f32 %v569_v9, 0.0 }
  0xea   : > { %v573_v12 = vpop.f32.mrf.mxu0 }
  0xeb   : > { %2628 = vmatprep.mubr.msk.f32.mxu0 %vm842_vm1, %v759_v10  ;;  %v760_v15 = vmax.f32 %v573_v12, 0.0 }
  0xec   : > { %v575_v13 = vpop.f32.mrf.mxu0  ;;  %1004 = vmatmul.mubr.f32.vlgmr.msra.gmra.mxu0 %v758_v11 }
  0xed   : > { %v761_v14 = vmax.f32 %v575_v13, 0.0 }
  0xee   : > { %v579_v16 = vpop.f32.mrf.mxu0 }
  0xef   : > { %2629 = vmatprep.mubr.msk.f32.mxu0 %vm842_vm1, %v761_v14  ;;  %v762_v19 = vmax.f32 %v579_v16, 0.0 }
  0xf0   : > { %v581_v17 = vpop.f32.mrf.mxu0  ;;  %1009 = vmatmul.mubr.f32.gmra.mxu0 %v760_v15 }
  0xf1   : > { %v763_v18 = vmax.f32 %v581_v17, 0.0  ;;  %1752 = vmatprep.mubr.f32.mxu0 %v3006_v4 }
  0xf2   : > { %v585_v20 = vpop.f32.mrf.mxu0 }
  0xf3   : > { %2630 = vmatprep.mubr.msk.f32.mxu1 %vm842_vm1, %v763_v18  ;;  %v764_v23 = vmax.f32 %v585_v20, 0.0 }
  0xf4   : > { %v587_v21 = vpop.f32.mrf.mxu0  ;;  %1014 = vmatmul.mubr.f32.vlgmr.msra.gmra.mxu1 %v762_v19 }
  0xf5   : > { %v765_v22 = vmax.f32 %v587_v21, 0.0 }
  0xf6   : > { %v591_v24 = vpop.f32.mrf.mxu0 }
  0xf7   : > { %2631 = vmatprep.mubr.msk.f32.mxu1 %vm842_vm1, %v765_v22  ;;  %v766_v27 = vmax.f32 %v591_v24, 0.0 }
  0xf8   : > { %v593_v25 = vpop.f32.mrf.mxu0  ;;  %1019 = vmatmul.mubr.f32.gmra.mxu1 %v764_v23 }
  0xf9   : > { %v767_v26 = vmax.f32 %v593_v25, 0.0 }
  0xfa   : > { %v597_v28 = vpop.f32.mrf.mxu0 }
  0xfb   : > { %2632 = vmatprep.mubr.msk.f32.mxu1 %vm842_vm1, %v767_v26  ;;  %v768_v31 = vmax.f32 %v597_v28, 0.0 }
  0xfc   : > { %v599_v29 = vpop.f32.mrf.mxu0  ;;  %1024 = vmatmul.mubr.f32.gmra.mxu1 %v766_v27 }
  0xfd   : > { %v769_v30 = vmax.f32 %v599_v29, 0.0 }
  0xfe   : > { %v603_v32 = vpop.f32.mrf.mxu0 }
  0xff   : > { %2633 = vmatprep.mubr.msk.f32.mxu1 %vm842_vm1, %v769_v30  ;;  %v770_v35 = vmax.f32 %v603_v32, 0.0 }
 0x100   : > { %v605_v33 = vpop.f32.mrf.mxu0  ;;  %1029 = vmatmul.mubr.f32.gmra.mxu1 %v768_v31 }
 0x101   : > { %v771_v34 = vmax.f32 %v605_v33, 0.0 }
 0x102   : > { %v609_v36 = vpop.f32.mrf.mxu0 }
 0x103   : > { %2634 = vmatprep.mubr.msk.f32.mxu1 %vm842_vm1, %v771_v34  ;;  %v772_v39 = vmax.f32 %v609_v36, 0.0 }
 0x104   : > { %v611_v37 = vpop.f32.mrf.mxu0  ;;  %1034 = vmatmul.mubr.f32.gmra.mxu1 %v770_v35 }
 0x105   : > { %v773_v38 = vmax.f32 %v611_v37, 0.0 }
 0x106   : > { %v615_v40 = vpop.f32.mrf.mxu0 }
 0x107   : > { %2635 = vmatprep.mubr.msk.f32.mxu1 %vm842_vm1, %v773_v38  ;;  %v774_v43 = vmax.f32 %v615_v40, 0.0 }
 0x108   : > { %v617_v41 = vpop.f32.mrf.mxu0  ;;  %1039 = vmatmul.mubr.f32.gmra.mxu1 %v772_v39 }
 0x109   : > { %v775_v42 = vmax.f32 %v617_v41, 0.0 }
 0x10a   : > { %v621_v44 = vpop.f32.mrf.mxu0 }
 0x10b   : > { %2636 = vmatprep.mubr.msk.f32.mxu1 %vm842_vm1, %v775_v42  ;;  %v776_v47 = vmax.f32 %v621_v44, 0.0 }
 0x10c   : > { %v623_v45 = vpop.f32.mrf.mxu0  ;;  %1044 = vmatmul.mubr.f32.gmra.mxu1 %v774_v43 }
 0x10d   : > { %v777_v46 = vmax.f32 %v623_v45, 0.0 }
 0x10e   : > { %v627_v48 = vpop.f32.mrf.mxu0 }
 0x10f   : > { %2637 = vmatprep.mubr.msk.f32.mxu1 %vm842_vm1, %v777_v46  ;;  %v778_v51 = vmax.f32 %v627_v48, 0.0 }
 0x110   : > { %v629_v49 = vpop.f32.mrf.mxu0  ;;  %1049 = vmatmul.mubr.f32.gmra.mxu1 %v776_v47 }
 0x111   : > { %v779_v50 = vmax.f32 %v629_v49, 0.0 }
 0x112   : > { %v633_v52 = vpop.f32.mrf.mxu0 }
 0x113   : > { %2638 = vmatprep.mubr.msk.f32.mxu1 %vm842_vm1, %v779_v50  ;;  %v780_v55 = vmax.f32 %v633_v52, 0.0 }
 0x114   : > { %v635_v53 = vpop.f32.mrf.mxu0  ;;  %1054 = vmatmul.mubr.f32.gmra.mxu1 %v778_v51 }
 0x115   : > { %v781_v54 = vmax.f32 %v635_v53, 0.0 }
 0x116   : > { %v639_v56 = vpop.f32.mrf.mxu0 }
 0x117   : > { %2639 = vmatprep.mubr.msk.f32.mxu1 %vm842_vm1, %v781_v54  ;;  %v782_v59 = vmax.f32 %v639_v56, 0.0 }
 0x118   : > { %v641_v57 = vpop.f32.mrf.mxu0  ;;  %1059 = vmatmul.mubr.f32.gmra.mxu1 %v780_v55 }
 0x119   : > { %v783_v58 = vmax.f32 %v641_v57, 0.0 }
 0x11a   : > { %v645_v60 = vpop.f32.mrf.mxu0 }
 0x11b   : > { %2640 = vmatprep.mubr.msk.f32.mxu1 %vm842_vm1, %v783_v58  ;;  %v784_v63 = vmax.f32 %v645_v60, 0.0 }
 0x11c   : > { %v647_v61 = vpop.f32.mrf.mxu0  ;;  %1064 = vmatmul.mubr.f32.gmra.mxu1 %v782_v59 }
 0x11d   : > { %v785_v62 = vmax.f32 %v647_v61, 0.0 }
 0x11e   : > { %v651_v0 = vpop.f32.mrf.mxu0 }
 0x11f   : > { %2641 = vmatprep.mubr.msk.f32.mxu1 %vm842_vm1, %v785_v62  ;;  %v786_v3 = vmax.f32 %v651_v0, 0.0 }
 0x120   : > { %v653_v1 = vpop.f32.mrf.mxu0  ;;  %1069 = vmatmul.mubr.f32.gmra.mxu1 %v784_v63 }
 0x121   : > { %v787_v2 = vmax.f32 %v653_v1, 0.0 }
 0x122   : > { %v657_v5 = vpop.f32.mrf.mxu0 }
 0x123   : > { %2642 = vmatprep.mubr.msk.f32.mxu1 %vm842_vm1, %v787_v2  ;;  %v788_v8 = vmax.f32 %v657_v5, 0.0 }
 0x124   : > { %v659_v6 = vpop.f32.mrf.mxu0  ;;  %1074 = vmatmul.mubr.f32.gmra.mxu1 %v786_v3 }
 0x125   : > { %v789_v7 = vmax.f32 %v659_v6, 0.0 }
 0x126   : > { %v663_v9 = vpop.f32.mrf.mxu0 }
 0x127   : > { %2643 = vmatprep.mubr.msk.f32.mxu1 %vm842_vm1, %v789_v7  ;;  %v790_v12 = vmax.f32 %v663_v9, 0.0 }
 0x128   : > { %v665_v10 = vpop.f32.mrf.mxu0  ;;  %1079 = vmatmul.mubr.f32.gmra.mxu1 %v788_v8 }
 0x129   : > { %v791_v11 = vmax.f32 %v665_v10, 0.0  ;;  %v1164_v10 = vld [vmem:[%s3403_s21] sm:$0xff] }
 0x12a   : > { %v669_v13 = vpop.f32.mrf.mxu0 }
 0x12b   : > { %2644 = vmatprep.mubr.msk.f32.mxu1 %vm842_vm1, %v791_v11  ;;  %v792_v16 = vmax.f32 %v669_v13, 0.0 }
 0x12c   : > { %v671_v14 = vpop.f32.mrf.mxu0  ;;  %1084 = vmatmul.mubr.f32.gmra.mxu1 %v790_v12 }
 0x12d   : > { %v793_v15 = vmax.f32 %v671_v14, 0.0  ;;  %v1165_v14 = vld [vmem:[%s3403_s21 + $0x8] sm:$0xff] }
 0x12e   : > { %v675_v17 = vpop.f32.mrf.mxu0 }
 0x12f   : > { %2645 = vmatprep.mubr.msk.f32.mxu1 %vm842_vm1, %v793_v15  ;;  %v794_v20 = vmax.f32 %v675_v17, 0.0 }
 0x130   : > { %v677_v18 = vpop.f32.mrf.mxu0  ;;  %1089 = vmatmul.mubr.f32.gmra.mxu1 %v792_v16 }
 0x131   : > { %v795_v19 = vmax.f32 %v677_v18, 0.0 }
 0x132   : > { %v681_v21 = vpop.f32.mrf.mxu0 }
 0x133   : > { %2646 = vmatprep.mubr.msk.f32.mxu1 %vm842_vm1, %v795_v19  ;;  %v796_v24 = vmax.f32 %v681_v21, 0.0  ;;  %v1166_v19 = vld [vmem:[%s3403_s21 + $0x10] sm:$0xff] }
 0x134   : > { %v683_v22 = vpop.f32.mrf.mxu0  ;;  %1094 = vmatmul.mubr.f32.gmra.mxu1 %v794_v20 }
 0x135   : > { %v797_v23 = vmax.f32 %v683_v22, 0.0 }
 0x136   : > { %v687_v25 = vpop.f32.mrf.mxu0 }
 0x137   : > { %2647 = vmatprep.mubr.msk.f32.mxu1 %vm842_vm1, %v797_v23  ;;  %v798_v28 = vmax.f32 %v687_v25, 0.0 }
 0x138   : > { %v689_v26 = vpop.f32.mrf.mxu0  ;;  %1099 = vmatmul.mubr.f32.gmra.mxu1 %v796_v24  ;;  %v1167_v24 = vld [vmem:[%s3403_s21 + $0x18] sm:$0xff] }
 0x139   : > { %v799_v27 = vmax.f32 %v689_v26, 0.0 }
 0x13a   : > { %v693_v29 = vpop.f32.mrf.mxu0 }
 0x13b   : > { %2648 = vmatprep.mubr.msk.f32.mxu1 %vm842_vm1, %v799_v27  ;;  %v800_v32 = vmax.f32 %v693_v29, 0.0  ;;  %v1168_v29 = vld [vmem:[%s3403_s21 + $0x20] sm:$0xff] }
 0x13c   : > { %v695_v30 = vpop.f32.mrf.mxu0  ;;  %1104 = vmatmul.mubr.f32.gmra.mxu1 %v798_v28 }
 0x13d   : > { %v801_v31 = vmax.f32 %v695_v30, 0.0 }
 0x13e   : > { %v699_v33 = vpop.f32.mrf.mxu0 }
 0x13f   : > { %2649 = vmatprep.mubr.msk.f32.mxu1 %vm842_vm1, %v801_v31  ;;  %v802_v36 = vmax.f32 %v699_v33, 0.0 }
 0x140   : > { %v701_v34 = vpop.f32.mrf.mxu0  ;;  %1109 = vmatmul.mubr.f32.gmra.mxu1 %v800_v32 }
 0x141   : > { %v803_v35 = vmax.f32 %v701_v34, 0.0  ;;  %v1169_v34 = vld [vmem:[%s3403_s21 + $0x28] sm:$0xff] }
 0x142   : > { %v705_v37 = vpop.f32.mrf.mxu0 }
 0x143   : > { %2650 = vmatprep.mubr.msk.f32.mxu1 %vm842_vm1, %v803_v35  ;;  %v804_v40 = vmax.f32 %v705_v37, 0.0 }
 0x144   : > { %v707_v38 = vpop.f32.mrf.mxu0  ;;  %1114 = vmatmul.mubr.f32.gmra.mxu1 %v802_v36 }
 0x145   : > { %v805_v39 = vmax.f32 %v707_v38, 0.0 }
 0x146   : > { %v711_v41 = vpop.f32.mrf.mxu0 }
 0x147   : > { %2651 = vmatprep.mubr.msk.f32.mxu1 %vm842_vm1, %v805_v39  ;;  %v806_v44 = vmax.f32 %v711_v41, 0.0  ;;  %v1170_v39 = vld [vmem:[%s3403_s21 + $0x30] sm:$0xff] }
 0x148   : > { %v713_v42 = vpop.f32.mrf.mxu0  ;;  %1119 = vmatmul.mubr.f32.gmra.mxu1 %v804_v40 }
 0x149   : > { %v807_v43 = vmax.f32 %v713_v42, 0.0 }
 0x14a   : > { %v717_v45 = vpop.f32.mrf.mxu0 }
 0x14b   : > { %2652 = vmatprep.mubr.msk.f32.mxu1 %vm842_vm1, %v807_v43  ;;  %v808_v48 = vmax.f32 %v717_v45, 0.0 }
 0x14c   : > { %v719_v46 = vpop.f32.mrf.mxu0  ;;  %1124 = vmatmul.mubr.f32.gmra.mxu1 %v806_v44  ;;  %v1171_v44 = vld [vmem:[%s3403_s21 + $0x38] sm:$0xff] }
 0x14d   : > { %v809_v47 = vmax.f32 %v719_v46, 0.0 }
 0x14e   : > { %v723_v49 = vpop.f32.mrf.mxu0 }
 0x14f   : > { %2653 = vmatprep.mubr.msk.f32.mxu1 %vm842_vm1, %v809_v47  ;;  %v810_v52 = vmax.f32 %v723_v49, 0.0  ;;  %v1172_v49 = vld [vmem:[%s3403_s21 + $0x40] sm:$0xff] }
 0x150   : > { %v725_v50 = vpop.f32.mrf.mxu0  ;;  %1129 = vmatmul.mubr.f32.gmra.mxu1 %v808_v48 }
 0x151   : > { %v811_v51 = vmax.f32 %v725_v50, 0.0 }
 0x152   : > { %v729_v53 = vpop.f32.mrf.mxu0 }
 0x153   : > { %2654 = vmatprep.mubr.msk.f32.mxu1 %vm842_vm1, %v811_v51  ;;  %v812_v56 = vmax.f32 %v729_v53, 0.0 }
 0x154   : > { %v731_v54 = vpop.f32.mrf.mxu0  ;;  %1134 = vmatmul.mubr.f32.gmra.mxu1 %v810_v52 }
 0x155   : > { %v813_v55 = vmax.f32 %v731_v54, 0.0  ;;  %v1173_v54 = vld [vmem:[%s3403_s21 + $0x48] sm:$0xff] }
 0x156   : > { %v735_v57 = vpop.f32.mrf.mxu0 }
 0x157   : > { %2655 = vmatprep.mubr.msk.f32.mxu1 %vm842_vm1, %v813_v55  ;;  %v814_v60 = vmax.f32 %v735_v57, 0.0 }
 0x158   : > { %v737_v58 = vpop.f32.mrf.mxu0  ;;  %1139 = vmatmul.mubr.f32.gmra.mxu1 %v812_v56 }
 0x159   : > { %v815_v59 = vmax.f32 %v737_v58, 0.0 }
 0x15a   : > { %v741_v61 = vpop.f32.mrf.mxu0 }
 0x15b   : > { %2656 = vmatprep.mubr.msk.f32.mxu1 %vm842_vm1, %v815_v59  ;;  %v816_v0 = vmax.f32 %v741_v61, 0.0  ;;  %v1174_v59 = vld [vmem:[%s3403_s21 + $0x50] sm:$0xff] }
 0x15c   : > { %v743_v62 = vpop.f32.mrf.mxu0  ;;  %1144 = vmatmul.mubr.f32.gmra.mxu1 %v814_v60 }
 0x15d   : > { %v817_v63 = vmax.f32 %v743_v62, 0.0 }
 0x15e   : > { %v747_v1 = vpop.f32.mrf.mxu0 }
 0x15f   : > { %2657 = vmatprep.mubr.msk.f32.mxu1 %vm842_vm1, %v817_v63  ;;  %v818_v5 = vmax.f32 %v747_v1, 0.0 }
 0x160   : > { %v749_v2 = vpop.f32.mrf.mxu0  ;;  %1149 = vmatmul.mubr.f32.gmra.mxu1 %v816_v0  ;;  %v1175_v0 = vld [vmem:[%s3403_s21 + $0x58] sm:$0xff] }
 0x161   : > { %v819_v3 = vmax.f32 %v749_v2, 0.0 }
 0x162   : > { %v753_v6 = vpop.f32.mrf.mxu0 }
 0x163   : > { %2658 = vmatprep.mubr.msk.f32.mxu1 %vm842_vm1, %v819_v3  ;;  %v820_v9 = vmax.f32 %v753_v6, 0.0  ;;  %v1176_v6 = vld [vmem:[%s3403_s21 + $0x60] sm:$0xff] }
 0x164   : > { %v755_v7 = vpop.f32.mrf.mxu0  ;;  %1154 = vmatmul.mubr.f32.gmra.mxu1 %v818_v5 }
 0x165   : > { %v821_v8 = vmax.f32 %v755_v7, 0.0 }
 0x167   : > { %2659 = vmatprep.mubr.msk.f32.mxu1 %vm842_vm1, %v821_v8 }
 0x168   : > { %1159 = vmatmul.mubr.f32.gmra.mxu1 %v820_v9 }
 0x1ac   : > { %v1005_v11 = vpop.f32.mrf.mxu0 }
 0x1ad   : > { %v3406_v12 = vmul.f32 %v1164_v10, %v1005_v11  ;;  %v1177_v11 = vld [vmem:[%s3403_s21 + $0x68] sm:$0xff] }
 0x1ae   : > { %v1007_v13 = vpop.f32.mrf.mxu0 }
 0x1af   : > { %v1229_v15 = vsel %vm1228_vm2, %v3406_v12, -inf }
 0x1b0   : > { %1230 = vmax.xlane.f32.xlu0 %v1229_v15  ;;  %v1010_v16 = vpop.f32.mrf.mxu0 }
 0x1b1   : > { %v3411_v17 = vmul.f32 %v1165_v14, %v1010_v16 }
 0x1b2   : > { %v1012_v18 = vpop.f32.mrf.mxu0 }
 0x1b3   : > { %v1232_v20 = vsel %vm1228_vm2, %v3411_v17, -inf  ;;  %v1178_v18 = vld [vmem:[%s3403_s21 + $0x70] sm:$0xff] }
 0x1b4   : > { %v1015_v21 = vpop.f32.mrf.mxu1  ;;  %1233 = vmax.xlane.f32.xlu0 %v1232_v20 }
 0x1b5   : > { %v3416_v22 = vmul.f32 %v1166_v19, %v1015_v21 }
 0x1b6   : > { %v1017_v23 = vpop.f32.mrf.mxu1 }
 0x1b7   : > { %v1235_v25 = vsel %vm1228_vm2, %v3416_v22, -inf }
 0x1b8   : > { %1236 = vmax.xlane.f32.xlu1 %v1235_v25  ;;  %v1020_v26 = vpop.f32.mrf.mxu1 }
 0x1b9   : > { %v3421_v27 = vmul.f32 %v1167_v24, %v1020_v26  ;;  %v1179_v24 = vld [vmem:[%s3403_s21 + $0x78] sm:$0xff] }
 0x1ba   : > { %v1022_v28 = vpop.f32.mrf.mxu1 }
 0x1bb   : > { %v1238_v30 = vsel %vm1228_vm2, %v3421_v27, -inf }
 0x1bc   : > { %1239 = vmax.xlane.f32.xlu1 %v1238_v30  ;;  %v1025_v31 = vpop.f32.mrf.mxu1  ;;  %v1180_v30 = vld [vmem:[%s3403_s21 + $0x80] sm:$0xff] }
 0x1bd   : > { %v3426_v32 = vmul.f32 %v1168_v29, %v1025_v31 }
 0x1be   : > { %v1027_v33 = vpop.f32.mrf.mxu1 }
 0x1bf   : > { %v1241_v35 = vsel %vm1228_vm2, %v3426_v32, -inf }
 0x1c0   : > { %v1030_v36 = vpop.f32.mrf.mxu1  ;;  %1242 = vmax.xlane.f32.xlu0 %v1241_v35 }
 0x1c1   : > { %v3431_v37 = vmul.f32 %v1169_v34, %v1030_v36  ;;  %v1181_v36 = vld [vmem:[%s3403_s21 + $0x88] sm:$0xff] }
 0x1c2   : > { %v1032_v38 = vpop.f32.mrf.mxu1 }
 0x1c3   : > { %v1244_v40 = vsel %vm1228_vm2, %v3431_v37, -inf }
 0x1c4   : > { %1245 = vmax.xlane.f32.xlu1 %v1244_v40  ;;  %v1035_v41 = vpop.f32.mrf.mxu1 }
 0x1c5   : > { %v3436_v42 = vmul.f32 %v1170_v39, %v1035_v41 }
 0x1c6   : > { %v1037_v43 = vpop.f32.mrf.mxu1 }
 0x1c7   : > { %v1247_v45 = vsel %vm1228_vm2, %v3436_v42, -inf  ;;  %v1182_v43 = vld [vmem:[%s3403_s21 + $0x90] sm:$0xff] }
 0x1c8   : > { %v1040_v46 = vpop.f32.mrf.mxu1  ;;  %1248 = vmax.xlane.f32.xlu0 %v1247_v45 }
 0x1c9   : > { %v3441_v47 = vmul.f32 %v1171_v44, %v1040_v46 }
 0x1ca   : > { %v1042_v48 = vpop.f32.mrf.mxu1 }
 0x1cb   : > { %v1250_v50 = vsel %vm1228_vm2, %v3441_v47, -inf }
 0x1cc   : > { %1251 = vmax.xlane.f32.xlu1 %v1250_v50  ;;  %v1045_v51 = vpop.f32.mrf.mxu1 }
 0x1cd   : > { %v3446_v52 = vmul.f32 %v1172_v49, %v1045_v51  ;;  %v1183_v49 = vld [vmem:[%s3403_s21 + $0x98] sm:$0xff] }
 0x1ce   : > { %v1047_v53 = vpop.f32.mrf.mxu1 }
 0x1cf   : > { %v1253_v55 = vsel %vm1228_vm2, %v3446_v52, -inf }
 0x1d0   : > { %v1050_v56 = vpop.f32.mrf.mxu1  ;;  %1254 = vmax.xlane.f32.xlu0 %v1253_v55  ;;  %v1184_v55 = vld [vmem:[%s3403_s21 + $0xa0] sm:$0xff] }
 0x1d1   : > { %v3451_v57 = vmul.f32 %v1173_v54, %v1050_v56 }
 0x1d2   : > { %v1052_v58 = vpop.f32.mrf.mxu1 }
 0x1d3   : > { %v1256_v60 = vsel %vm1228_vm2, %v3451_v57, -inf }
 0x1d4   : > { %1257 = vmax.xlane.f32.xlu1 %v1256_v60  ;;  %v1055_v61 = vpop.f32.mrf.mxu1 }
 0x1d5   : > { %v3456_v62 = vmul.f32 %v1174_v59, %v1055_v61  ;;  %v1185_v61 = vld [vmem:[%s3403_s21 + $0xa8] sm:$0xff] }
 0x1d6   : > { %v1057_v63 = vpop.f32.mrf.mxu1 }
 0x1d7   : > { %v1259_v1 = vsel %vm1228_vm2, %v3456_v62, -inf }
 0x1d8   : > { %v1060_v2 = vpop.f32.mrf.mxu1  ;;  %1260 = vmax.xlane.f32.xlu0 %v1259_v1 }
 0x1d9   : > { %v3461_v3 = vmul.f32 %v1175_v0, %v1060_v2 }
 0x1da   : > { %v1062_v5 = vpop.f32.mrf.mxu1 }
 0x1db   : > { %v1262_v7 = vsel %vm1228_vm2, %v3461_v3, -inf  ;;  %v1186_v5 = vld [vmem:[%s3403_s21 + $0xb0] sm:$0xff] }
 0x1dc   : > { %1263 = vmax.xlane.f32.xlu1 %v1262_v7  ;;  %v1065_v8 = vpop.f32.mrf.mxu1 }
 0x1dd   : > { %v3466_v9 = vmul.f32 %v1176_v6, %v1065_v8 }
 0x1de   : > { %v1067_v10 = vpop.f32.mrf.mxu1 }
 0x1df   : > { %v1265_v13 = vsel %vm1228_vm2, %v3466_v9, -inf }
 0x1e0   : > { %v1070_v14 = vpop.f32.mrf.mxu1  ;;  %1266 = vmax.xlane.f32.xlu0 %v1265_v13 }
 0x1e1   : > { %v3471_v15 = vmul.f32 %v1177_v11, %v1070_v14  ;;  %v1187_v11 = vld [vmem:[%s3403_s21 + $0xb8] sm:$0xff] }
 0x1e2   : > { %v1072_v16 = vpop.f32.mrf.mxu1 }
 0x1e3   : > { %v1268_v19 = vsel %vm1228_vm2, %v3471_v15, -inf }
 0x1e4   : > { %1269 = vmax.xlane.f32.xlu1 %v1268_v19  ;;  %v1075_v20 = vpop.f32.mrf.mxu1  ;;  %v1188_v19 = vld [vmem:[%s3403_s21 + $0xc0] sm:$0xff] }
 0x1e5   : > { %v3476_v21 = vmul.f32 %v1178_v18, %v1075_v20 }
 0x1e6   : > { %v1077_v23 = vpop.f32.mrf.mxu1 }
 0x1e7   : > { %v1271_v25 = vsel %vm1228_vm2, %v3476_v21, -inf }
 0x1e8   : > { %v1080_v26 = vpop.f32.mrf.mxu1  ;;  %1272 = vmax.xlane.f32.xlu0 %v1271_v25 }
 0x1e9   : > { %v3481_v28 = vmul.f32 %v1179_v24, %v1080_v26  ;;  %v1189_v26 = vld [vmem:[%s3403_s21 + $0xc8] sm:$0xff] }
 0x1ea   : > { %v1082_v29 = vpop.f32.mrf.mxu1 }
 0x1eb   : > { %v1274_v31 = vsel %vm1228_vm2, %v3481_v28, -inf }
 0x1ec   : > { %1275 = vmax.xlane.f32.xlu1 %v1274_v31  ;;  %v1085_v33 = vpop.f32.mrf.mxu1 }
 0x1ed   : > { %v3486_v34 = vmul.f32 %v1180_v30, %v1085_v33 }
 0x1ee   : > { %v1087_v35 = vpop.f32.mrf.mxu1 }
 0x1ef   : > { %v1277_v38 = vsel %vm1228_vm2, %v3486_v34, -inf  ;;  %v1190_v35 = vld [vmem:[%s3403_s21 + $0xd0] sm:$0xff] }
 0x1f0   : > { %v1090_v39 = vpop.f32.mrf.mxu1  ;;  %1278 = vmax.xlane.f32.xlu0 %v1277_v38 }
 0x1f1   : > { %v3491_v40 = vmul.f32 %v1181_v36, %v1090_v39 }
 0x1f2   : > { %v1092_v41 = vpop.f32.mrf.mxu1 }
 0x1f3   : > { %v1280_v44 = vsel %vm1228_vm2, %v3491_v40, -inf }
 0x1f4   : > { %1281 = vmax.xlane.f32.xlu1 %v1280_v44  ;;  %v1095_v45 = vpop.f32.mrf.mxu1 }
 0x1f5   : > { %v3496_v46 = vmul.f32 %v1182_v43, %v1095_v45  ;;  %v1191_v43 = vld [vmem:[%s3403_s21 + $0xd8] sm:$0xff] }
 0x1f6   : > { %v1097_v48 = vpop.f32.mrf.mxu1 }
 0x1f7   : > { %v1283_v50 = vsel %vm1228_vm2, %v3496_v46, -inf }
 0x1f8   : > { %v1100_v51 = vpop.f32.mrf.mxu1  ;;  %1284 = vmax.xlane.f32.xlu0 %v1283_v50  ;;  %v1192_v50 = vld [vmem:[%s3403_s21 + $0xe0] sm:$0xff] }
 0x1f9   : > { %v3501_v53 = vmul.f32 %v1183_v49, %v1100_v51 }
 0x1fa   : > { %v1102_v54 = vpop.f32.mrf.mxu1 }
 0x1fb   : > { %v1286_v56 = vsel %vm1228_vm2, %v3501_v53, -inf }
 0x1fc   : > { %1287 = vmax.xlane.f32.xlu1 %v1286_v56  ;;  %v1105_v58 = vpop.f32.mrf.mxu1 }
 0x1fd   : > { %v3506_v59 = vmul.f32 %v1184_v55, %v1105_v58  ;;  %v1193_v58 = vld [vmem:[%s3403_s21 + $0xe8] sm:$0xff] }
 0x1fe   : > { %v1107_v60 = vpop.f32.mrf.mxu1 }
 0x1ff   : > { %v1289_v63 = vsel %vm1228_vm2, %v3506_v59, -inf }
 0x200   : > { %v1110_v0 = vpop.f32.mrf.mxu1  ;;  %1290 = vmax.xlane.f32.xlu0 %v1289_v63 }
 0x201   : > { %v3511_v1 = vmul.f32 %v1185_v61, %v1110_v0 }
 0x202   : > { %v1112_v2 = vpop.f32.mrf.mxu1 }
 0x203   : > { %v1292_v6 = vsel %vm1228_vm2, %v3511_v1, -inf  ;;  %v1194_v2 = vld [vmem:[%s3403_s21 + $0xf0] sm:$0xff] }
 0x204   : > { %1293 = vmax.xlane.f32.xlu1 %v1292_v6  ;;  %v1115_v7 = vpop.f32.mrf.mxu1 }
 0x205   : > { %v3516_v8 = vmul.f32 %v1186_v5, %v1115_v7 }
 0x206   : > { %v1117_v10 = vpop.f32.mrf.mxu1 }
 0x207   : > { %v1295_v13 = vsel %vm1228_vm2, %v3516_v8, -inf }
 0x208   : > { %v1120_v14 = vpop.f32.mrf.mxu1  ;;  %1296 = vmax.xlane.f32.xlu0 %v1295_v13 }
 0x209   : > { %v3521_v16 = vmul.f32 %v1187_v11, %v1120_v14  ;;  %v1195_v11 = vld [vmem:[%s3403_s21 + $0xf8] sm:$0xff]  ;;  %s3907_s21 = scalar_lea.vmem %s4163_s1, %s2732_s19  ;;  %s4114_s19 = scalar_lea.hbm %s4170_s8, %s2733_s12 }
 0x20a   : > { %v1122_v18 = vpop.f32.mrf.mxu1 }
 0x20b   : > { %v1298_v20 = vsel %vm1228_vm2, %v3521_v16, -inf }
 0x20c   : > { %v1125_v23 = vpop.f32.mrf.mxu1  ;;  %1299 = vmax.xlane.f32.xlu0 %v1298_v20 }
 0x20d   : > { %v3526_v24 = vmul.f32 %v1188_v19, %v1125_v23 }
 0x20e   : > { %v1127_v25 = vpop.f32.mrf.mxu1 }
 0x20f   : > { %v1301_v29 = vsel %vm1228_vm2, %v3526_v24, -inf }
 0x210   : > { %v1130_v30 = vpop.f32.mrf.mxu1  ;;  %1302 = vmax.xlane.f32.xlu0 %v1301_v29 }
 0x211   : > { %v3531_v31 = vmul.f32 %v1189_v26, %v1130_v30 }
 0x212   : > { %v1132_v33 = vpop.f32.mrf.mxu1 }
 0x213   : > { %v1304_v36 = vsel %vm1228_vm2, %v3531_v31, -inf }
 0x214   : > { %v1135_v38 = vpop.f32.mrf.mxu1  ;;  %1305 = vmax.xlane.f32.xlu0 %v1304_v36 }
 0x215   : > { %v3536_v39 = vmul.f32 %v1190_v35, %v1135_v38 }
 0x216   : > { %v1137_v41 = vpop.f32.mrf.mxu1 }
 0x217   : > { %v1307_v44 = vsel %vm1228_vm2, %v3536_v39, -inf }
 0x218   : > { %v1140_v45 = vpop.f32.mrf.mxu1  ;;  %1308 = vmax.xlane.f32.xlu0 %v1307_v44 }
 0x219   : > { %v3541_v48 = vmul.f32 %v1191_v43, %v1140_v45 }
 0x21a   : > { %v1142_v49 = vpop.f32.mrf.mxu1 }
 0x21b   : > { %v1310_v51 = vsel %vm1228_vm2, %v3541_v48, -inf }
 0x21c   : > { %v1145_v54 = vpop.f32.mrf.mxu1  ;;  %1311 = vmax.xlane.f32.xlu0 %v1310_v51 }
 0x21d   : > { %v3546_v55 = vmul.f32 %v1192_v50, %v1145_v54 }
 0x21e   : > { %v1147_v56 = vpop.f32.mrf.mxu1 }
 0x21f   : > { %v1313_v60 = vsel %vm1228_vm2, %v3546_v55, -inf }
 0x220   : > { %v1150_v61 = vpop.f32.mrf.mxu1  ;;  %1314 = vmax.xlane.f32.xlu0 %v1313_v60 }
 0x221   : > { %v3551_v63 = vmul.f32 %v1193_v58, %v1150_v61 }
 0x222   : > { %v1152_v0 = vpop.f32.mrf.mxu1 }
 0x223   : > { %v1316_v5 = vsel %vm1228_vm2, %v3551_v63, -inf }
 0x224   : > { %v1155_v6 = vpop.f32.mrf.mxu1  ;;  %1317 = vmax.xlane.f32.xlu0 %v1316_v5 }
 0x225   : > { %v3556_v7 = vmul.f32 %v1194_v2, %v1155_v6 }
 0x226   : > { %v1157_v10 = vpop.f32.mrf.mxu1 }
 0x227   : > { %v1319_v13 = vsel %vm1228_vm2, %v3556_v7, -inf }
 0x228   : > { %1320 = vmax.xlane.f32.xlu0 %v1319_v13  ;;  %v1160_v14 = vpop.f32.mrf.mxu1 }
 0x229   : > { %v3561_v18 = vmul.f32 %v1195_v11, %v1160_v14 }
 0x22a   : > { %v1162_v19 = vpop.f32.mrf.mxu1 }
 0x22b   : > { %v1322_v20 = vsel %vm1228_vm2, %v3561_v18, -inf }
 0x22c   : > { %1323 = vmax.xlane.f32.xlu0 %v1322_v20 }
 0x239   : > { %v1231_v23 = vpop.xlane.xlu0 %1230 }
 0x23a   : > { %v1325_v25 = vsub.f32 %v3406_v12, %v1231_v23 }
 0x23c   : > { %v1357_v26 = vmul.f32 1.442695, %v1325_v25 }
 0x23d   : > { %v1234_v29 = vpop.xlane.xlu0 %1233 }
 0x23e   : > { %2816 = vpow2.f32 %v1357_v26  ;;  %v1326_v30 = vsub.f32 %v3411_v17, %v1234_v29 }
 0x240   : > { %v1359_v33 = vmul.f32 1.442695, %v1326_v30  ;;  %v1584_v30 = vld [vmem:[%s4167_s5 + $0x18] sm:$0x1] }
 0x241   : > { %v1237_v35 = vpop.xlane.xlu1 %1236  ;;  %2660 = vmatprep.subr.msk.mxu0 %vm1681_vm3, %v1584_v30 }
 0x242   : > { %2818 = vpow2.f32 %v1359_v33  ;;  %v1327_v36 = vsub.f32 %v3416_v22, %v1237_v35 }
 0x244   : > { %v1361_v38 = vmul.f32 1.442695, %v1327_v36 }
 0x245   : > { %v1240_v41 = vpop.xlane.xlu1 %1239 }
 0x246   : > { %2820 = vpow2.f32 %v1361_v38  ;;  %v1328_v43 = vsub.f32 %v3421_v27, %v1240_v41  ;;  %v1581_v41 = vld [vmem:[%s4167_s5] sm:$0xff] }
 0x248   : > { %v1363_v44 = vmul.f32 1.442695, %v1328_v43 }
 0x249   : > { %v1243_v45 = vpop.xlane.xlu0 %1242 }
 0x24a   : > { %2822 = vpow2.f32 %v1363_v44  ;;  %v1329_v12 = vsub.f32 %v3426_v32, %v1243_v45 }
 0x24b   : > { %v3570_v49 = vpop.eup %2816 }
 0x24c   : > { %v1365_v50 = vmul.f32 1.442695, %v1329_v12  ;;  %v1421_v17 = vsel %vm1228_vm2, %v3570_v49, 0.0 }
 0x24d   : > { %v1246_v51 = vpop.xlane.xlu1 %1245  ;;  %1422 = vadd.xlane.f32.xlu1 %v1421_v17 }
 0x24e   : > { %2824 = vpow2.f32 %v1365_v50  ;;  %v1330_v22 = vsub.f32 %v3431_v37, %v1246_v51 }
 0x24f   : > { %v3575_v54 = vpop.eup %2818 }
 0x250   : > { %v1367_v56 = vmul.f32 1.442695, %v1330_v22  ;;  %v1424_v27 = vsel %vm1228_vm2, %v3575_v54, 0.0 }
 0x251   : > { %1425 = vadd.xlane.f32.xlu1 %v1424_v27  ;;  %v1249_v58 = vpop.xlane.xlu0 %1248 }
 0x252   : > { %2826 = vpow2.f32 %v1367_v56  ;;  %v1331_v32 = vsub.f32 %v3436_v42, %v1249_v58 }
 0x253   : > { %v3580_v60 = vpop.eup %2820 }
 0x254   : > { %v1369_v61 = vmul.f32 1.442695, %v1331_v32  ;;  %v1427_v0 = vsel %vm1228_vm2, %v3580_v60, 0.0 }
 0x255   : > { %v1252_v2 = vpop.xlane.xlu1 %1251  ;;  %1428 = vadd.xlane.f32.xlu1 %v1427_v0 }
 0x256   : > { %2828 = vpow2.f32 %v1369_v61  ;;  %v1332_v37 = vsub.f32 %v3441_v47, %v1252_v2 }
 0x257   : > { %v3585_v5 = vpop.eup %2822 }
 0x258   : > { %v1371_v6 = vmul.f32 1.442695, %v1332_v37  ;;  %v1430_v10 = vsel %vm1228_vm2, %v3585_v5, 0.0 }
 0x259   : > { %1431 = vadd.xlane.f32.xlu1 %v1430_v10  ;;  %v1255_v11 = vpop.xlane.xlu0 %1254 }
 0x25a   : > { %2830 = vpow2.f32 %v1371_v6  ;;  %v1333_v42 = vsub.f32 %v3446_v52, %v1255_v11 }
 0x25b   : > { %v3590_v13 = vpop.eup %2824 }
 0x25c   : > { %v1373_v14 = vmul.f32 1.442695, %v1333_v42  ;;  %v1433_v19 = vsel %vm1228_vm2, %v3590_v13, 0.0 }
 0x25d   : > { %v1258_v20 = vpop.xlane.xlu1 %1257  ;;  %1434 = vadd.xlane.f32.xlu1 %v1433_v19 }
 0x25e   : > { %2832 = vpow2.f32 %v1373_v14  ;;  %v1334_v47 = vsub.f32 %v3451_v57, %v1258_v20  ;;  %v1583_v57 = vld [vmem:[%s4167_s5 + $0x10] sm:$0x1] }
 0x25f   : > { %v3595_v23 = vpop.eup %2826  ;;  %2661 = vmatpush1.msk.msra.mxu0 %vm1681_vm3, %v1583_v57 }
 0x260   : > { %v1375_v25 = vmul.f32 1.442695, %v1334_v47  ;;  %v1436_v26 = vsel %vm1228_vm2, %v3595_v23, 0.0 }
 0x261   : > { %1437 = vadd.xlane.f32.xlu1 %v1436_v26  ;;  %v1261_v29 = vpop.xlane.xlu0 %1260 }
 0x262   : > { %2834 = vpow2.f32 %v1375_v25  ;;  %v1335_v52 = vsub.f32 %v3456_v62, %v1261_v29  ;;  %v1582_v62 = vld [vmem:[%s4167_s5 + $0x8] sm:$0xff] }
 0x263   : > { %v3603_v33 = vpop.eup %2828  ;;  %1718 = vmatprep.subr.mxu0 %v1582_v62 }
 0x264   : > { %v1377_v35 = vmul.f32 1.442695, %v1335_v52  ;;  %v1439_v36 = vsel %vm1228_vm2, %v3603_v33, 0.0  ;;  %1719 = vmatpush1.msra.mxu0 %v1581_v41 }
 0x265   : > { %v1264_v38 = vpop.xlane.xlu1 %1263  ;;  %1440 = vadd.xlane.f32.xlu1 %v1439_v36 }
 0x266   : > { %2836 = vpow2.f32 %v1377_v35  ;;  %v1336_v43 = vsub.f32 %v3461_v3, %v1264_v38 }
 0x267   : > { %v3617_v44 = vpop.eup %2830 }
 0x268   : > { %v1379_v45 = vmul.f32 1.442695, %v1336_v43  ;;  %v1442_v12 = vsel %vm1228_vm2, %v3617_v44, 0.0 }
 0x269   : > { %1443 = vadd.xlane.f32.xlu1 %v1442_v12  ;;  %v1267_v50 = vpop.xlane.xlu0 %1266 }
 0x26a   : > { %2838 = vpow2.f32 %v1379_v45  ;;  %v1337_v17 = vsub.f32 %v3466_v9, %v1267_v50 }
 0x26b   : > { %v3622_v51 = vpop.eup %2832 }
 0x26c   : > { %v1381_v22 = vmul.f32 1.442695, %v1337_v17  ;;  %v1445_v56 = vsel %vm1228_vm2, %v3622_v51, 0.0 }
 0x26d   : > { %v1270_v27 = vpop.xlane.xlu1 %1269  ;;  %1446 = vadd.xlane.f32.xlu1 %v1445_v56 }
 0x26e   : > { %2840 = vpow2.f32 %v1381_v22  ;;  %v1338_v3 = vsub.f32 %v3471_v15, %v1270_v27 }
 0x26f   : > { %v3627_v58 = vpop.eup %2834 }
 0x270   : > { %v1383_v32 = vmul.f32 1.442695, %v1338_v3  ;;  %v1448_v61 = vsel %vm1228_vm2, %v3627_v58, 0.0 }
 0x271   : > { %1449 = vadd.xlane.f32.xlu1 %v1448_v61  ;;  %v1273_v0 = vpop.xlane.xlu0 %1272 }
 0x272   : > { %2842 = vpow2.f32 %v1383_v32  ;;  %v1339_v9 = vsub.f32 %v3476_v21, %v1273_v0 }
 0x273   : > { %v3632_v2 = vpop.eup %2836 }
 0x274   : > { %v1385_v37 = vmul.f32 1.442695, %v1339_v9  ;;  %v1451_v6 = vsel %vm1228_vm2, %v3632_v2, 0.0 }
 0x275   : > { %v1276_v10 = vpop.xlane.xlu1 %1275  ;;  %1452 = vadd.xlane.f32.xlu0 %v1451_v6 }
 0x276   : > { %2844 = vpow2.f32 %v1385_v37  ;;  %v1340_v15 = vsub.f32 %v3481_v28, %v1276_v10 }
 0x277   : > { %v3637_v11 = vpop.eup %2838 }
 0x278   : > { %v1387_v42 = vmul.f32 1.442695, %v1340_v15  ;;  %v1454_v14 = vsel %vm1228_vm2, %v3637_v11, 0.0 }
 0x279   : > { %1455 = vadd.xlane.f32.xlu1 %v1454_v14  ;;  %v1279_v19 = vpop.xlane.xlu0 %1278 }
 0x27a   : > { %2846 = vpow2.f32 %v1387_v42  ;;  %v1341_v21 = vsub.f32 %v3486_v34, %v1279_v19 }
 0x27b   : > { %v3642_v20 = vpop.eup %2840 }
 0x27c   : > { %v1389_v47 = vmul.f32 1.442695, %v1341_v21  ;;  %v1457_v25 = vsel %vm1228_vm2, %v3642_v20, 0.0 }
 0x27d   : > { %v1282_v26 = vpop.xlane.xlu1 %1281  ;;  %1458 = vadd.xlane.f32.xlu0 %v1457_v25 }
 0x27e   : > { %2848 = vpow2.f32 %v1389_v47  ;;  %v1342_v28 = vsub.f32 %v3491_v40, %v1282_v26 }
 0x27f   : > { %v3647_v29 = vpop.eup %2842 }
 0x280   : > { %v1391_v52 = vmul.f32 1.442695, %v1342_v28  ;;  %v1460_v30 = vsel %vm1228_vm2, %v3647_v29, 0.0 }
 0x281   : > { %1461 = vadd.xlane.f32.xlu1 %v1460_v30  ;;  %v1285_v57 = vpop.xlane.xlu0 %1284 }
 0x282   : > { %2850 = vpow2.f32 %v1391_v52  ;;  %v1343_v34 = vsub.f32 %v3496_v46, %v1285_v57 }
 0x283   : > { %v3652_v35 = vpop.eup %2844 }
 0x284   : > { %v1393_v36 = vmul.f32 1.442695, %v1343_v34  ;;  %v1463_v62 = vsel %vm1228_vm2, %v3652_v35, 0.0 }
 0x285   : > { %v1288_v38 = vpop.xlane.xlu1 %1287  ;;  %1464 = vadd.xlane.f32.xlu0 %v1463_v62 }
 0x286   : > { %2852 = vpow2.f32 %v1393_v36  ;;  %v1344_v40 = vsub.f32 %v3501_v53, %v1288_v38 }
 0x287   : > { %v3657_v41 = vpop.eup %2846 }
 0x288   : > { %v1395_v43 = vmul.f32 1.442695, %v1344_v40  ;;  %v1466_v45 = vsel %vm1228_vm2, %v3657_v41, 0.0 }
 0x289   : > { %1467 = vadd.xlane.f32.xlu1 %v1466_v45  ;;  %v1291_v12 = vpop.xlane.xlu0 %1290 }
 0x28a   : > { %2854 = vpow2.f32 %v1395_v43  ;;  %v1345_v46 = vsub.f32 %v3506_v59, %v1291_v12 }
 0x28b   : > { %v3662_v50 = vpop.eup %2848 }
 0x28c   : > { %v1397_v17 = vmul.f32 1.442695, %v1345_v46  ;;  %v1469_v22 = vsel %vm1228_vm2, %v3662_v50, 0.0 }
 0x28d   : > { %v1294_v56 = vpop.xlane.xlu1 %1293  ;;  %1470 = vadd.xlane.f32.xlu0 %v1469_v22 }
 0x28e   : > { %2856 = vpow2.f32 %v1397_v17  ;;  %v1346_v53 = vsub.f32 %v3511_v1, %v1294_v56 }
 0x28f   : > { %v3667_v27 = vpop.eup %2850 }
 0x290   : > { %v1399_v3 = vmul.f32 1.442695, %v1346_v53  ;;  %v1472_v32 = vsel %vm1228_vm2, %v3667_v27, 0.0 }
 0x291   : > { %1473 = vadd.xlane.f32.xlu1 %v1472_v32  ;;  %v1297_v61 = vpop.xlane.xlu0 %1296 }
 0x292   : > { %2858 = vpow2.f32 %v1399_v3  ;;  %v1347_v59 = vsub.f32 %v3516_v8, %v1297_v61 }
 0x293   : > { %v3672_v0 = vpop.eup %2852 }
 0x294   : > { %v1401_v9 = vmul.f32 1.442695, %v1347_v59  ;;  %v1475_v37 = vsel %vm1228_vm2, %v3672_v0, 0.0  ;;  %v2088_v59 = vld [vmem:[%s4168_s6 + $0x78] sm:$0xff] }
 0x295   : > { %v1300_v6 = vpop.xlane.xlu0 %1299  ;;  %1476 = vadd.xlane.f32.xlu0 %v1475_v37  ;;  %2196 = vmatpush1.msra.mxu1 %v2088_v59  ;;  %v2076_v59 = vld [vmem:[%s4168_s6 + $0x18] sm:$0xff] }
 0x296   : > { %2860 = vpow2.f32 %v1401_v9  ;;  %v1348_v1 = vsub.f32 %v3521_v16, %v1300_v6  ;;  %2197 = vmatprep.subr.mxu1 %v3006_v4 }
 0x297   : > { %v3677_v10 = vpop.eup %2854 }
 0x298   : > { %v1403_v15 = vmul.f32 1.442695, %v1348_v1  ;;  %v1478_v42 = vsel %vm1228_vm2, %v3677_v10, 0.0 }
 0x299   : > { %1479 = vadd.xlane.f32.xlu1 %v1478_v42  ;;  %v1303_v14 = vpop.xlane.xlu0 %1302 }
 0x29a   : > { %2862 = vpow2.f32 %v1403_v15  ;;  %v1349_v8 = vsub.f32 %v3526_v24, %v1303_v14  ;;  %v2087_v14 = vld [vmem:[%s4168_s6 + $0x70] sm:$0xff] }
 0x29b   : > { %v3682_v19 = vpop.eup %2856  ;;  %2198 = vmatpush1.msra.mxu1 %v2087_v14 }
 0x29c   : > { %v1405_v21 = vmul.f32 1.442695, %v1349_v8  ;;  %v1481_v47 = vsel %vm1228_vm2, %v3682_v19, 0.0  ;;  %2199 = vmatprep.subr.mxu1 %v3006_v4 }
 0x29d   : > { %v1306_v25 = vpop.xlane.xlu0 %1305  ;;  %1482 = vadd.xlane.f32.xlu0 %v1481_v47 }
 0x29e   : > { %2864 = vpow2.f32 %v1405_v21  ;;  %v1350_v16 = vsub.f32 %v3531_v31, %v1306_v25  ;;  %v2086_v25 = vld [vmem:[%s4168_s6 + $0x68] sm:$0xff] }
 0x29f   : > { %v3687_v26 = vpop.eup %2858  ;;  %2200 = vmatpush1.msra.mxu1 %v2086_v25 }
 0x2a0   : > { %v1407_v28 = vmul.f32 1.442695, %v1350_v16  ;;  %v1484_v52 = vsel %vm1228_vm2, %v3687_v26, 0.0  ;;  %2201 = vmatprep.subr.mxu1 %v3006_v4 }
 0x2a1   : > { %1485 = vadd.xlane.f32.xlu1 %v1484_v52  ;;  %v1309_v30 = vpop.xlane.xlu0 %1308  ;;  %v2085_v52 = vld [vmem:[%s4168_s6 + $0x60] sm:$0xff] }
 0x2a2   : > { %2866 = vpow2.f32 %v1407_v28  ;;  %v1351_v24 = vsub.f32 %v3536_v39, %v1309_v30  ;;  %2202 = vmatpush1.msra.mxu1 %v2085_v52 }
 0x2a3   : > { %v3692_v57 = vpop.eup %2860  ;;  %2203 = vmatprep.subr.mxu1 %v3006_v4 }
 0x2a4   : > { %v1409_v34 = vmul.f32 1.442695, %v1351_v24  ;;  %v1487_v36 = vsel %vm1228_vm2, %v3692_v57, 0.0  ;;  %v2084_v24 = vld [vmem:[%s4168_s6 + $0x58] sm:$0xff] }
 0x2a5   : > { %v1312_v62 = vpop.xlane.xlu0 %1311  ;;  %1488 = vadd.xlane.f32.xlu0 %v1487_v36  ;;  %2204 = vmatpush1.msra.mxu1 %v2084_v24  ;;  %v2083_v36 = vld [vmem:[%s4168_s6 + $0x50] sm:$0xff] }
 0x2a6   : > { %2868 = vpow2.f32 %v1409_v34  ;;  %v1352_v31 = vsub.f32 %v3541_v48, %v1312_v62  ;;  %2205 = vmatprep.subr.mxu1 %v3006_v4 }
 0x2a7   : > { %v3697_v38 = vpop.eup %2862  ;;  %2206 = vmatpush1.msra.mxu1 %v2083_v36 }
 0x2a8   : > { %v1411_v40 = vmul.f32 1.442695, %v1352_v31  ;;  %v1490_v43 = vsel %vm1228_vm2, %v3697_v38, 0.0  ;;  %2207 = vmatprep.subr.mxu1 %v3006_v4  ;;  %v2082_v31 = vld [vmem:[%s4168_s6 + $0x48] sm:$0xff] }
 0x2a9   : > { %1491 = vadd.xlane.f32.xlu1 %v1490_v43  ;;  %v1315_v45 = vpop.xlane.xlu0 %1314  ;;  %2208 = vmatpush1.msra.mxu1 %v2082_v31 }
 0x2aa   : > { %2870 = vpow2.f32 %v1411_v40  ;;  %v1353_v39 = vsub.f32 %v3546_v55, %v1315_v45  ;;  %2209 = vmatprep.subr.mxu1 %v3006_v4  ;;  %v2081_v45 = vld [vmem:[%s4168_s6 + $0x40] sm:$0xff] }
 0x2ab   : > { %v3702_v12 = vpop.eup %2864  ;;  %2210 = vmatpush1.msra.mxu1 %v2081_v45 }
 0x2ac   : > { %v1413_v46 = vmul.f32 1.442695, %v1353_v39  ;;  %v1493_v17 = vsel %vm1228_vm2, %v3702_v12, 0.0  ;;  %v2080_v39 = vld [vmem:[%s4168_s6 + $0x38] sm:$0xff]  ;;  %2211 = vmatprep.subr.mxu1 %v3006_v4 }
 0x2ad   : > { %v1318_v22 = vpop.xlane.xlu0 %1317  ;;  %1494 = vadd.xlane.f32.xlu0 %v1493_v17  ;;  %2212 = vmatpush1.msra.mxu1 %v2080_v39 }
 0x2ae   : > { %2872 = vpow2.f32 %v1413_v46  ;;  %v1354_v48 = vsub.f32 %v3551_v63, %v1318_v22  ;;  %v2079_v22 = vld [vmem:[%s4168_s6 + $0x30] sm:$0xff]  ;;  %2213 = vmatprep.subr.mxu1 %v3006_v4 }
 0x2af   : > { %v3707_v56 = vpop.eup %2866  ;;  %2214 = vmatpush1.msra.mxu1 %v2079_v22 }
 0x2b0   : > { %v1415_v53 = vmul.f32 1.442695, %v1354_v48  ;;  %v1496_v3 = vsel %vm1228_vm2, %v3707_v56, 0.0  ;;  %2215 = vmatprep.subr.mxu1 %v3006_v4 }
 0x2b1   : > { %1497 = vadd.xlane.f32.xlu1 %v1496_v3  ;;  %v1321_v32 = vpop.xlane.xlu0 %1320 }
 0x2b2   : > { %2874 = vpow2.f32 %v1415_v53  ;;  %v1355_v55 = vsub.f32 %v3556_v7, %v1321_v32  ;;  %v2078_v53 = vld [vmem:[%s4168_s6 + $0x28] sm:$0xff]  ;;  %v2077_v32 = vld [vmem:[%s4168_s6 + $0x20] sm:$0xff] }
 0x2b3   : > { %v3712_v61 = vpop.eup %2868  ;;  %2216 = vmatpush1.msra.mxu1 %v2078_v53 }
 0x2b4   : > { %v1417_v9 = vmul.f32 1.442695, %v1355_v55  ;;  %v1499_v63 = vsel %vm1228_vm2, %v3712_v61, 0.0  ;;  %2217 = vmatprep.subr.mxu1 %v3006_v4 }
 0x2b5   : > { %1500 = vadd.xlane.f32.xlu0 %v1499_v63  ;;  %v1324_v37 = vpop.xlane.xlu0 %1323  ;;  %2218 = vmatpush1.msra.mxu1 %v2077_v32  ;;  %v2075_v63 = vld [vmem:[%s4168_s6 + $0x10] sm:$0xff] }
 0x2b6   : > { %2876 = vpow2.f32 %v1417_v9  ;;  %v1356_v6 = vsub.f32 %v3561_v18, %v1324_v37  ;;  %2219 = vmatprep.subr.mxu1 %v3006_v4 }
 0x2b7   : > { %v3721_v1 = vpop.eup %2870  ;;  %2220 = vmatpush1.msra.mxu1 %v2076_v59 }
 0x2b8   : > { %v1419_v7 = vmul.f32 1.442695, %v1356_v6  ;;  %v1502_v15 = vsel %vm1228_vm2, %v3721_v1, 0.0  ;;  %2221 = vmatprep.subr.mxu1 %v3006_v4  ;;  %v2074_v6 = vld [vmem:[%s4168_s6 + $0x8] sm:$0xff] }
 0x2b9   : > { %1503 = vadd.xlane.f32.xlu1 %v1502_v15  ;;  %2222 = vmatpush1.msra.mxu1 %v2075_v63  ;;  %v2073_v15 = vld [vmem:[%s4168_s6] sm:$0xff] }
 0x2ba   : > { %2878 = vpow2.f32 %v1419_v7  ;;  %2223 = vmatprep.subr.mxu1 %v3006_v4 }
 0x2bb   : > { %v3725_v42 = vpop.eup %2872  ;;  %2224 = vmatpush1.msra.mxu1 %v2074_v6 }
 0x2bc   : > { %v1505_v8 = vsel %vm1228_vm2, %v3725_v42, 0.0  ;;  %2225 = vmatprep.subr.mxu1 %v3006_v4 }
 0x2bd   : > { %1506 = vadd.xlane.f32.xlu0 %v1505_v8  ;;  %v2090_v8 = vld [vmem:[%s4168_s6 + $0x88] sm:$0xff]  ;;  %2226 = vmatpush1.msra.mxu1 %v2073_v15 }
 0x2be   : > { %2255 = vmatprep.subr.mxu1 %v3006_v4 }
 0x2bf   : > { %v3733_v18 = vpop.eup %2874  ;;  %2256 = vmatpush2.msra.mxu1 %v2090_v8 }
 0x2c0   : > { %v1508_v21 = vsel %vm1228_vm2, %v3733_v18, 0.0  ;;  %2257 = vmatprep.subr.mxu1 %v3006_v4 }
 0x2c1   : > { %1509 = vadd.xlane.f32.xlu1 %v1508_v21 }
 0x2c3   : > { %v3737_v47 = vpop.eup %2876 }
 0x2c4   : > { %v1511_v16 = vsel %vm1228_vm2, %v3737_v47, 0.0 }
 0x2c5   : > { %1512 = vadd.xlane.f32.xlu0 %v1511_v16 }
 0x2c7   : > { %v3745_v28 = vpop.eup %2878 }
 0x2c8   : > { %v1514_v30 = vsel %vm1228_vm2, %v3745_v28, 0.0 }
 0x2c9   : > { %1515 = vadd.xlane.f32.xlu1 %v1514_v30 }
 0x2d6   : > { %v1423_v34 = vpop.xlane.xlu1 %1422 }
 0x2d7   : > { %2880 = vrcp.f32 %v1423_v34 }
 0x2da   : > { %v1426_v62 = vpop.xlane.xlu1 %1425 }
 0x2db   : > { %2882 = vrcp.f32 %v1426_v62 }
 0x2de   : > { %v1429_v40 = vpop.xlane.xlu1 %1428 }
 0x2df   : > { %2884 = vrcp.f32 %v1429_v40 }
 0x2e2   : > { %v1432_v43 = vpop.xlane.xlu1 %1431 }
 0x2e3   : > { %2886 = vrcp.f32 %v1432_v43 }
 0x2e4   : > { %v2881_v46 = vpop.eup %2880 }
 0x2e5   : > { %v1549_v17 = vmul.f32 %v2881_v46, %v3570_v49 }
 0x2e6   : > { %v1435_v48 = vpop.xlane.xlu1 %1434 }
 0x2e7   : > { %2888 = vrcp.f32 %v1435_v48  ;;  %2662 = vmatmul.mubr.msk.f32.vlgmr.msra.gmra.mxu0 %vm1228_vm2, %v1549_v17 }
 0x2e8   : > { %v2883_v3 = vpop.eup %2882  ;;  %1758 = vmatprep.mubr.f32.mxu0 %v3006_v4 }
 0x2e9   : > { %v1550_v49 = vmul.f32 %v2883_v3, %v3575_v54 }
 0x2ea   : > { %v1438_v55 = vpop.xlane.xlu1 %1437 }
 0x2eb   : > { %2890 = vrcp.f32 %v1438_v55  ;;  %2663 = vmatmul.mubr.msk.f32.gmra.mxu0 %vm1228_vm2, %v1550_v49 }
 0x2ec   : > { %v2885_v9 = vpop.eup %2884  ;;  %1764 = vmatprep.mubr.f32.mxu0 %v3006_v4 }
 0x2ed   : > { %v1551_v54 = vmul.f32 %v2885_v9, %v3580_v60 }
 0x2ee   : > { %v1441_v37 = vpop.xlane.xlu1 %1440 }
 0x2ef   : > { %2892 = vrcp.f32 %v1441_v37  ;;  %2664 = vmatmul.mubr.msk.f32.gmra.mxu0 %vm1228_vm2, %v1551_v54 }
 0x2f0   : > { %v2887_v7 = vpop.eup %2886  ;;  %1770 = vmatprep.mubr.f32.mxu0 %v3006_v4 }
 0x2f1   : > { %v1552_v60 = vmul.f32 %v2887_v7, %v3585_v5 }
 0x2f2   : > { %v1444_v14 = vpop.xlane.xlu1 %1443 }
 0x2f3   : > { %2894 = vrcp.f32 %v1444_v14  ;;  %2665 = vmatmul.mubr.msk.f32.gmra.mxu0 %vm1228_vm2, %v1552_v60 }
 0x2f4   : > { %v2889_v21 = vpop.eup %2888  ;;  %1776 = vmatprep.mubr.f32.mxu0 %v3006_v4 }
 0x2f5   : > { %v1553_v5 = vmul.f32 %v2889_v21, %v3590_v13 }
 0x2f6   : > { %v1447_v25 = vpop.xlane.xlu1 %1446 }
 0x2f7   : > { %2896 = vrcp.f32 %v1447_v25  ;;  %2666 = vmatmul.mubr.msk.f32.gmra.mxu0 %vm1228_vm2, %v1553_v5 }
 0x2f8   : > { %v2891_v16 = vpop.eup %2890  ;;  %1782 = vmatprep.mubr.f32.mxu0 %v3006_v4 }
 0x2f9   : > { %v1554_v52 = vmul.f32 %v2891_v16, %v3595_v23 }
 0x2fa   : > { %v1450_v30 = vpop.xlane.xlu1 %1449 }
 0x2fb   : > { %2898 = vrcp.f32 %v1450_v30  ;;  %2667 = vmatmul.mubr.msk.f32.gmra.mxu0 %vm1228_vm2, %v1554_v52 }
 0x2fc   : > { %v2893_v24 = vpop.eup %2892  ;;  %1788 = vmatprep.mubr.f32.mxu0 %v3006_v4 }
 0x2fd   : > { %v1555_v13 = vmul.f32 %v2893_v24, %v3603_v33 }
 0x2fe   : > { %v1453_v34 = vpop.xlane.xlu0 %1452 }
 0x2ff   : > { %2900 = vrcp.f32 %v1453_v34  ;;  %2668 = vmatmul.mubr.msk.f32.gmra.mxu0 %vm1228_vm2, %v1555_v13 }
 0x300   : > { %v2895_v36 = vpop.eup %2894  ;;  %1794 = vmatprep.mubr.f32.mxu0 %v3006_v4 }
 0x301   : > { %v1556_v62 = vmul.f32 %v2895_v36, %v3617_v44 }
 0x302   : > { %v1456_v31 = vpop.xlane.xlu1 %1455 }
 0x303   : > { %2902 = vrcp.f32 %v1456_v31  ;;  %2669 = vmatmul.mubr.msk.f32.gmra.mxu0 %vm1228_vm2, %v1556_v62 }
 0x304   : > { %v2897_v23 = vpop.eup %2896  ;;  %1800 = vmatprep.mubr.f32.mxu0 %v3006_v4 }
 0x305   : > { %v1557_v40 = vmul.f32 %v2897_v23, %v3622_v51 }
 0x306   : > { %v1459_v43 = vpop.xlane.xlu0 %1458 }
 0x307   : > { %2904 = vrcp.f32 %v1459_v43  ;;  %2670 = vmatmul.mubr.msk.f32.gmra.mxu0 %vm1228_vm2, %v1557_v40 }
 0x308   : > { %v2899_v33 = vpop.eup %2898  ;;  %1806 = vmatprep.mubr.f32.mxu0 %v3006_v4 }
 0x309   : > { %v1558_v45 = vmul.f32 %v2899_v33, %v3627_v58 }
 0x30a   : > { %v1462_v39 = vpop.xlane.xlu1 %1461 }
 0x30b   : > { %2906 = vrcp.f32 %v1462_v39  ;;  %2671 = vmatmul.mubr.msk.f32.gmra.mxu0 %vm1228_vm2, %v1558_v45 }
 0x30c   : > { %v2901_v44 = vpop.eup %2900  ;;  %1812 = vmatprep.mubr.f32.mxu0 %v3006_v4 }
 0x30d   : > { %v1559_v46 = vmul.f32 %v2901_v44, %v3632_v2 }
 0x30e   : > { %v1465_v17 = vpop.xlane.xlu0 %1464 }
 0x30f   : > { %2908 = vrcp.f32 %v1465_v17  ;;  %2672 = vmatmul.mubr.msk.f32.gmra.mxu0 %vm1228_vm2, %v1559_v46 }
 0x310   : > { %v2903_v51 = vpop.eup %2902  ;;  %1818 = vmatprep.mubr.f32.mxu0 %v3006_v4 }
 0x311   : > { %v1560_v22 = vmul.f32 %v2903_v51, %v3637_v11  ;;  %v1945_v51 = vld [vmem:[%s3907_s21] sm:$0xff] }
 0x312   : > { %v1468_v48 = vpop.xlane.xlu1 %1467 }
 0x313   : > { %2910 = vrcp.f32 %v1468_v48  ;;  %2673 = vmatmul.mubr.msk.f32.gmra.mxu0 %vm1228_vm2, %v1560_v22 }
 0x314   : > { %v2905_v58 = vpop.eup %2904  ;;  %1824 = vmatprep.mubr.f32.mxu0 %v3006_v4 }
 0x315   : > { %v1561_v53 = vmul.f32 %v2905_v58, %v3642_v20  ;;  %v1948_v58 = vld [vmem:[%s3907_s21 + $0x18] sm:$0xff] }
 0x316   : > { %v1471_v3 = vpop.xlane.xlu0 %1470 }
 0x317   : > { %2912 = vrcp.f32 %v1471_v3  ;;  %2674 = vmatmul.mubr.msk.f32.gmra.mxu0 %vm1228_vm2, %v1561_v53  ;;  %v1947_v53 = vld [vmem:[%s3907_s21 + $0x10] sm:$0xff] }
 0x318   : > { %v2907_v2 = vpop.eup %2906  ;;  %1830 = vmatprep.mubr.f32.mxu0 %v3006_v4 }
 0x319   : > { %v1562_v49 = vmul.f32 %v2907_v2, %v3647_v29 }
 0x31a   : > { %v1474_v32 = vpop.xlane.xlu1 %1473 }
 0x31b   : > { %2914 = vrcp.f32 %v1474_v32  ;;  %2675 = vmatmul.mubr.msk.f32.gmra.mxu0 %vm1228_vm2, %v1562_v49 }
 0x31c   : > { %v2909_v11 = vpop.eup %2908  ;;  %1836 = vmatprep.mubr.f32.mxu0 %v3006_v4 }
 0x31d   : > { %v1563_v55 = vmul.f32 %v2909_v11, %v3652_v35  ;;  %v1950_v11 = vld [vmem:[%s3907_s21 + $0x28] sm:$0xff] }
 0x31e   : > { %v1477_v59 = vpop.xlane.xlu0 %1476 }
 0x31f   : > { %2916 = vrcp.f32 %v1477_v59  ;;  %2676 = vmatmul.mubr.msk.f32.gmra.mxu0 %vm1228_vm2, %v1563_v55  ;;  %v1949_v55 = vld [vmem:[%s3907_s21 + $0x20] sm:$0xff] }
 0x320   : > { %v2911_v20 = vpop.eup %2910  ;;  %1842 = vmatprep.mubr.f32.mxu0 %v3006_v4 }
 0x321   : > { %v1564_v9 = vmul.f32 %v2911_v20, %v3657_v41  ;;  %v2089_v41 = vld [vmem:[%s4168_s6 + $0x80] sm:$0xff] }
 0x322   : > { %v1480_v54 = vpop.xlane.xlu1 %1479  ;;  %2258 = vmatpush2.msra.mxu1 %v2089_v41 }
 0x323   : > { %2918 = vrcp.f32 %v1480_v54  ;;  %2677 = vmatmul.mubr.msk.f32.gmra.mxu0 %vm1228_vm2, %v1564_v9 }
 0x324   : > { %v2913_v29 = vpop.eup %2912  ;;  %1848 = vmatprep.mubr.f32.mxu0 %v3006_v4 }
 0x325   : > { %v1565_v63 = vmul.f32 %v2913_v29, %v3662_v50  ;;  %v1952_v29 = vld [vmem:[%s3907_s21 + $0x38] sm:$0xff] }
 0x326   : > { %v1483_v37 = vpop.xlane.xlu0 %1482 }
 0x327   : > { %2920 = vrcp.f32 %v1483_v37  ;;  %2678 = vmatmul.mubr.msk.f32.gmra.mxu0 %vm1228_vm2, %v1565_v63  ;;  %v1951_v63 = vld [vmem:[%s3907_s21 + $0x30] sm:$0xff] }
 0x328   : > { %v2915_v35 = vpop.eup %2914  ;;  %1854 = vmatprep.mubr.f32.mxu0 %v3006_v4 }
 0x329   : > { %v1566_v6 = vmul.f32 %v2915_v35, %v3667_v27 }
 0x32a   : > { %v1486_v7 = vpop.xlane.xlu1 %1485 }
 0x32b   : > { %2922 = vrcp.f32 %v1486_v7  ;;  %2679 = vmatmul.mubr.msk.f32.gmra.mxu0 %vm1228_vm2, %v1566_v6  ;;  %v1954_v7 = vld [vmem:[%s3907_s21 + $0x48] sm:$0xff] }
 0x32c   : > { %v2917_v60 = vpop.eup %2916  ;;  %1860 = vmatprep.mubr.f32.mxu0 %v3006_v4 }
 0x32d   : > { %v1567_v50 = vmul.f32 %v2917_v60, %v3672_v0  ;;  %v1953_v60 = vld [vmem:[%s3907_s21 + $0x40] sm:$0xff] }
 0x32e   : > { %v1489_v15 = vpop.xlane.xlu0 %1488 }
 0x32f   : > { %2924 = vrcp.f32 %v1489_v15  ;;  %2680 = vmatmul.mubr.msk.f32.gmra.mxu0 %vm1228_vm2, %v1567_v50 }
 0x330   : > { %v2919_v14 = vpop.eup %2918  ;;  %1866 = vmatprep.mubr.f32.mxu0 %v3006_v4 }
 0x331   : > { %v1568_v8 = vmul.f32 %v2919_v14, %v3677_v10 }
 0x332   : > { %v1492_v27 = vpop.xlane.xlu1 %1491 }
 0x333   : > { %2926 = vrcp.f32 %v1492_v27  ;;  %2681 = vmatmul.mubr.msk.f32.gmra.mxu0 %vm1228_vm2, %v1568_v8  ;;  %v1956_v27 = vld [vmem:[%s3907_s21 + $0x58] sm:$0xff] }
 0x334   : > { %v2921_v21 = vpop.eup %2920  ;;  %1872 = vmatprep.mubr.f32.mxu0 %v3006_v4 }
 0x335   : > { %v1569_v5 = vmul.f32 %v2921_v21, %v3682_v19  ;;  %v1955_v21 = vld [vmem:[%s3907_s21 + $0x50] sm:$0xff] }
 0x336   : > { %v1495_v25 = vpop.xlane.xlu0 %1494 }
 0x337   : > { %2928 = vrcp.f32 %v1495_v25  ;;  %2682 = vmatmul.mubr.msk.f32.gmra.mxu0 %vm1228_vm2, %v1569_v5 }
 0x338   : > { %v2923_v0 = vpop.eup %2922  ;;  %1878 = vmatprep.mubr.f32.mxu0 %v3006_v4 }
 0x339   : > { %v1570_v16 = vmul.f32 %v2923_v0, %v3687_v26 }
 0x33a   : > { %v1498_v52 = vpop.xlane.xlu1 %1497 }
 0x33b   : > { %2930 = vrcp.f32 %v1498_v52  ;;  %2683 = vmatmul.mubr.msk.f32.gmra.mxu0 %vm1228_vm2, %v1570_v16  ;;  %v1958_v52 = vld [vmem:[%s3907_s21 + $0x68] sm:$0xff] }
 0x33c   : > { %v2925_v10 = vpop.eup %2924  ;;  %1884 = vmatprep.mubr.f32.mxu0 %v3006_v4 }
 0x33d   : > { %v1571_v30 = vmul.f32 %v2925_v10, %v3692_v57  ;;  %v1957_v10 = vld [vmem:[%s3907_s21 + $0x60] sm:$0xff] }
 0x33e   : > { %v1501_v24 = vpop.xlane.xlu0 %1500 }
 0x33f   : > { %2932 = vrcp.f32 %v1501_v24  ;;  %2684 = vmatmul.mubr.msk.f32.gmra.mxu0 %vm1228_vm2, %v1571_v30 }
 0x340   : > { %v2927_v19 = vpop.eup %2926  ;;  %1890 = vmatprep.mubr.f32.mxu0 %v3006_v4 }
 0x341   : > { %v1572_v13 = vmul.f32 %v2927_v19, %v3697_v38 }
 0x342   : > { %v1504_v34 = vpop.xlane.xlu1 %1503 }
 0x343   : > { %2934 = vrcp.f32 %v1504_v34  ;;  %2685 = vmatmul.mubr.msk.f32.gmra.mxu0 %vm1228_vm2, %v1572_v13  ;;  %v1960_v34 = vld [vmem:[%s3907_s21 + $0x78] sm:$0xff] }
 0x344   : > { %v2929_v26 = vpop.eup %2928  ;;  %1896 = vmatprep.mubr.f32.mxu0 %v3006_v4 }
 0x345   : > { %v1573_v36 = vmul.f32 %v2929_v26, %v3702_v12  ;;  %v1959_v26 = vld [vmem:[%s3907_s21 + $0x70] sm:$0xff] }
 0x346   : > { %v1507_v62 = vpop.xlane.xlu0 %1506 }
 0x347   : > { %2936 = vrcp.f32 %v1507_v62  ;;  %2686 = vmatmul.mubr.msk.f32.gmra.mxu0 %vm1228_vm2, %v1573_v36 }
 0x348   : > { %v2931_v57 = vpop.eup %2930  ;;  %1902 = vmatprep.mubr.f32.mxu0 %v3006_v4 }
 0x349   : > { %v1574_v31 = vmul.f32 %v2931_v57, %v3707_v56 }
 0x34a   : > { %v1510_v23 = vpop.xlane.xlu1 %1509 }
 0x34b   : > { %2938 = vrcp.f32 %v1510_v23  ;;  %2687 = vmatmul.mubr.msk.f32.gmra.mxu0 %vm1228_vm2, %v1574_v31  ;;  %v1962_v23 = vld [vmem:[%s3907_s21 + $0x88] sm:$0xff] }
 0x34c   : > { %v2933_v38 = vpop.eup %2932  ;;  %1908 = vmatprep.mubr.f32.mxu0 %v3006_v4 }
 0x34d   : > { %v1575_v40 = vmul.f32 %v2933_v38, %v3712_v61  ;;  %v1961_v38 = vld [vmem:[%s3907_s21 + $0x80] sm:$0xff] }
 0x34e   : > { %v1513_v43 = vpop.xlane.xlu0 %1512 }
 0x34f   : > { %2940 = vrcp.f32 %v1513_v43  ;;  %2688 = vmatmul.mubr.msk.f32.gmra.mxu0 %vm1228_vm2, %v1575_v40 }
 0x350   : > { %v2935_v12 = vpop.eup %2934  ;;  %1914 = vmatprep.mubr.f32.mxu0 %v3006_v4 }
 0x351   : > { %v1576_v33 = vmul.f32 %v2935_v12, %v3721_v1 }
 0x352   : > { %v1516_v45 = vpop.xlane.xlu1 %1515 }
 0x353   : > { %2942 = vrcp.f32 %v1516_v45  ;;  %2689 = vmatmul.mubr.msk.f32.gmra.mxu0 %vm1228_vm2, %v1576_v33  ;;  %v1964_v45 = vld [vmem:[%s3907_s21 + $0x98] sm:$0xff] }
 0x354   : > { %v2937_v56 = vpop.eup %2936  ;;  %1920 = vmatprep.mubr.f32.mxu0 %v3006_v4 }
 0x355   : > { %v1577_v39 = vmul.f32 %v2937_v56, %v3725_v42  ;;  %v1963_v56 = vld [vmem:[%s3907_s21 + $0x90] sm:$0xff] }
 0x357   : > { %2690 = vmatmul.mubr.msk.f32.gmra.mxu0 %vm1228_vm2, %v1577_v39 }
 0x358   : > { %v2939_v61 = vpop.eup %2938  ;;  %1926 = vmatprep.mubr.f32.mxu0 %v3006_v4 }
 0x359   : > { %v1578_v44 = vmul.f32 %v2939_v61, %v3733_v18 }
 0x35b   : > { %2691 = vmatmul.mubr.msk.f32.gmra.mxu0 %vm1228_vm2, %v1578_v44 }
 0x35c   : > { %v2941_v1 = vpop.eup %2940  ;;  %1932 = vmatprep.mubr.f32.mxu0 %v3006_v4 }
 0x35d   : > { %v1579_v46 = vmul.f32 %v2941_v1, %v3737_v47  ;;  %v1946_v47 = vld [vmem:[%s3907_s21 + $0x8] sm:$0xff] }
 0x35f   : > { %2692 = vmatmul.mubr.msk.f32.gmra.mxu0 %vm1228_vm2, %v1579_v46  ;;  %v1966_v46 = vld [vmem:[%s3907_s21 + $0xa8] sm:$0xff] }
 0x360   : > { %v2943_v17 = vpop.eup %2942  ;;  %1938 = vmatprep.mubr.f32.mxu0 %v3006_v4 }
 0x361   : > { %v1580_v42 = vmul.f32 %v2943_v17, %v3745_v28  ;;  %v1965_v17 = vld [vmem:[%s3907_s21 + $0xa0] sm:$0xff] }
 0x363   : > { %2693 = vmatmul.mubr.msk.f32.gmra.mxu0 %vm1228_vm2, %v1580_v42 }
 0x3a7   : > { %v1754_v18 = vpop.f32.mrf.mxu0 }
 0x3a8   : > { %v2009_v22 = vmul.f32 %v1945_v51, %v1754_v18 }
 0x3a9   : > { %v1756_v4 = vpop.f32.mrf.mxu0 }
 0x3aa   : > { %v2010_v28 = vmul.f32 %v1946_v47, %v1756_v4  ;;  %v1968_v4 = vld [vmem:[%s3907_s21 + $0xb8] sm:$0xff] }
 0x3ab   : > { %v1760_v48 = vpop.f32.mrf.mxu0 }
 0x3ac   : > { %2695 = vmatprep.mubr.msk.f32.mxu1 %vm2098_vm4, %v2010_v28  ;;  %v2011_v49 = vmul.f32 %v1947_v53, %v1760_v48  ;;  %v1967_v28 = vld [vmem:[%s3907_s21 + $0xb0] sm:$0xff] }
 0x3ad   : > { %v1762_v3 = vpop.f32.mrf.mxu0  ;;  %2260 = vmatmul.mubr.f32.vlgmr.msra.gmra.mxu1 %v2009_v22 }
 0x3ae   : > { %v2012_v2 = vmul.f32 %v1948_v58, %v1762_v3  ;;  %v1970_v3 = vld [vmem:[%s3907_s21 + $0xc8] sm:$0xff] }
 0x3af   : > { %v1766_v32 = vpop.f32.mrf.mxu0 }
 0x3b0   : > { %2696 = vmatprep.mubr.msk.f32.mxu1 %vm2098_vm4, %v2012_v2  ;;  %v2013_v9 = vmul.f32 %v1949_v55, %v1766_v32  ;;  %v1969_v2 = vld [vmem:[%s3907_s21 + $0xc0] sm:$0xff] }
 0x3b1   : > { %v1768_v59 = vpop.f32.mrf.mxu0  ;;  %2265 = vmatmul.mubr.f32.gmra.mxu1 %v2011_v49 }
 0x3b2   : > { %v2014_v20 = vmul.f32 %v1950_v11, %v1768_v59  ;;  %v1972_v59 = vld [vmem:[%s3907_s21 + $0xd8] sm:$0xff] }
 0x3b3   : > { %v1772_v54 = vpop.f32.mrf.mxu0 }
 0x3b4   : > { %2697 = vmatprep.mubr.msk.f32.mxu1 %vm2098_vm4, %v2014_v20  ;;  %v2015_v41 = vmul.f32 %v1951_v63, %v1772_v54  ;;  %v1971_v20 = vld [vmem:[%s3907_s21 + $0xd0] sm:$0xff] }
 0x3b5   : > { %v1774_v37 = vpop.f32.mrf.mxu0  ;;  %2270 = vmatmul.mubr.f32.gmra.mxu1 %v2013_v9 }
 0x3b6   : > { %v2016_v35 = vmul.f32 %v1952_v29, %v1774_v37  ;;  %v1974_v37 = vld [vmem:[%s3907_s21 + $0xe8] sm:$0xff] }
 0x3b7   : > { %v1778_v6 = vpop.f32.mrf.mxu0 }
 0x3b8   : > { %2698 = vmatprep.mubr.msk.f32.mxu1 %vm2098_vm4, %v2016_v35  ;;  %v2017_v14 = vmul.f32 %v1953_v60, %v1778_v6  ;;  %v1973_v35 = vld [vmem:[%s3907_s21 + $0xe0] sm:$0xff] }
 0x3b9   : > { %v1780_v50 = vpop.f32.mrf.mxu0  ;;  %2275 = vmatmul.mubr.f32.gmra.mxu1 %v2015_v41 }
 0x3ba   : > { %v2018_v15 = vmul.f32 %v1954_v7, %v1780_v50  ;;  %v1976_v50 = vld [vmem:[%s3907_s21 + $0xf8] sm:$0xff] }
 0x3bb   : > { %v1784_v8 = vpop.f32.mrf.mxu0 }
 0x3bc   : > { %2699 = vmatprep.mubr.msk.f32.mxu1 %vm2098_vm4, %v2018_v15  ;;  %v2019_v0 = vmul.f32 %v1955_v21, %v1784_v8  ;;  %v1975_v15 = vld [vmem:[%s3907_s21 + $0xf0] sm:$0xff] }
 0x3bd   : > { %v1786_v5 = vpop.f32.mrf.mxu0  ;;  %2280 = vmatmul.mubr.f32.gmra.mxu1 %v2017_v14 }
 0x3be   : > { %v2020_v25 = vmul.f32 %v1956_v27, %v1786_v5  ;;  %v1978_v5 = vld [vmem:[%s3907_s21 + $0x108] sm:$0xff] }
 0x3bf   : > { %v1790_v16 = vpop.f32.mrf.mxu0 }
 0x3c0   : > { %2700 = vmatprep.mubr.msk.f32.mxu1 %vm2098_vm4, %v2020_v25  ;;  %v2021_v19 = vmul.f32 %v1957_v10, %v1790_v16  ;;  %v1977_v25 = vld [vmem:[%s3907_s21 + $0x100] sm:$0xff] }
 0x3c1   : > { %v1792_v30 = vpop.f32.mrf.mxu0  ;;  %2285 = vmatmul.mubr.f32.gmra.mxu1 %v2019_v0 }
 0x3c2   : > { %v2022_v24 = vmul.f32 %v1958_v52, %v1792_v30  ;;  %v1980_v30 = vld [vmem:[%s3907_s21 + $0x118] sm:$0xff] }
 0x3c3   : > { %v1796_v13 = vpop.f32.mrf.mxu0 }
 0x3c4   : > { %2701 = vmatprep.mubr.msk.f32.mxu1 %vm2098_vm4, %v2022_v24  ;;  %v2023_v57 = vmul.f32 %v1959_v26, %v1796_v13  ;;  %v1979_v24 = vld [vmem:[%s3907_s21 + $0x110] sm:$0xff] }
 0x3c5   : > { %v1798_v36 = vpop.f32.mrf.mxu0  ;;  %2290 = vmatmul.mubr.f32.gmra.mxu1 %v2021_v19 }
 0x3c6   : > { %v2024_v62 = vmul.f32 %v1960_v34, %v1798_v36  ;;  %v1982_v36 = vld [vmem:[%s3907_s21 + $0x128] sm:$0xff] }
 0x3c7   : > { %v1802_v31 = vpop.f32.mrf.mxu0 }
 0x3c8   : > { %2702 = vmatprep.mubr.msk.f32.mxu1 %vm2098_vm4, %v2024_v62  ;;  %v2025_v12 = vmul.f32 %v1961_v38, %v1802_v31  ;;  %v1981_v62 = vld [vmem:[%s3907_s21 + $0x120] sm:$0xff] }
 0x3c9   : > { %v1804_v40 = vpop.f32.mrf.mxu0  ;;  %2295 = vmatmul.mubr.f32.gmra.mxu1 %v2023_v57 }
 0x3ca   : > { %v2026_v43 = vmul.f32 %v1962_v23, %v1804_v40  ;;  %v1984_v40 = vld [vmem:[%s3907_s21 + $0x138] sm:$0xff] }
 0x3cb   : > { %v1808_v33 = vpop.f32.mrf.mxu0 }
 0x3cc   : > { %2703 = vmatprep.mubr.msk.f32.mxu1 %vm2098_vm4, %v2026_v43  ;;  %v2027_v44 = vmul.f32 %v1963_v56, %v1808_v33  ;;  %v1983_v43 = vld [vmem:[%s3907_s21 + $0x130] sm:$0xff] }
 0x3cd   : > { %v1810_v39 = vpop.f32.mrf.mxu0  ;;  %2300 = vmatmul.mubr.f32.gmra.mxu1 %v2025_v12 }
 0x3ce   : > { %v2028_v61 = vmul.f32 %v1964_v45, %v1810_v39  ;;  %v1986_v39 = vld [vmem:[%s3907_s21 + $0x148] sm:$0xff] }
 0x3cf   : > { %v1814_v1 = vpop.f32.mrf.mxu0 }
 0x3d0   : > { %2704 = vmatprep.mubr.msk.f32.mxu1 %vm2098_vm4, %v2028_v61  ;;  %v2029_v47 = vmul.f32 %v1965_v17, %v1814_v1  ;;  %v1985_v61 = vld [vmem:[%s3907_s21 + $0x140] sm:$0xff] }
 0x3d1   : > { %v1816_v42 = vpop.f32.mrf.mxu0  ;;  %2305 = vmatmul.mubr.f32.gmra.mxu1 %v2027_v44 }
 0x3d2   : > { %v2030_v18 = vmul.f32 %v1966_v46, %v1816_v42  ;;  %v1988_v42 = vld [vmem:[%s3907_s21 + $0x158] sm:$0xff] }
 0x3d3   : > { %v1820_v51 = vpop.f32.mrf.mxu0 }
 0x3d4   : > { %2705 = vmatprep.mubr.msk.f32.mxu1 %vm2098_vm4, %v2030_v18  ;;  %v2031_v58 = vmul.f32 %v1967_v28, %v1820_v51  ;;  %v1987_v18 = vld [vmem:[%s3907_s21 + $0x150] sm:$0xff] }
 0x3d5   : > { %v1822_v22 = vpop.f32.mrf.mxu0  ;;  %2310 = vmatmul.mubr.f32.gmra.mxu1 %v2029_v47 }
 0x3d6   : > { %v2032_v48 = vmul.f32 %v1968_v4, %v1822_v22  ;;  %v1990_v22 = vld [vmem:[%s3907_s21 + $0x168] sm:$0xff] }
 0x3d7   : > { %v1826_v53 = vpop.f32.mrf.mxu0 }
 0x3d8   : > { %2706 = vmatprep.mubr.msk.f32.mxu1 %vm2098_vm4, %v2032_v48  ;;  %v2033_v11 = vmul.f32 %v1969_v2, %v1826_v53  ;;  %v1989_v48 = vld [vmem:[%s3907_s21 + $0x160] sm:$0xff] }
 0x3d9   : > { %v1828_v49 = vpop.f32.mrf.mxu0  ;;  %2315 = vmatmul.mubr.f32.gmra.mxu1 %v2031_v58 }
 0x3da   : > { %v2034_v32 = vmul.f32 %v1970_v3, %v1828_v49  ;;  %v1992_v49 = vld [vmem:[%s3907_s21 + $0x178] sm:$0xff] }
 0x3db   : > { %v1832_v55 = vpop.f32.mrf.mxu0 }
 0x3dc   : > { %2707 = vmatprep.mubr.msk.f32.mxu1 %vm2098_vm4, %v2034_v32  ;;  %v2035_v29 = vmul.f32 %v1971_v20, %v1832_v55  ;;  %v1991_v32 = vld [vmem:[%s3907_s21 + $0x170] sm:$0xff] }
 0x3dd   : > { %v1834_v9 = vpop.f32.mrf.mxu0  ;;  %2320 = vmatmul.mubr.f32.gmra.mxu1 %v2033_v11 }
 0x3de   : > { %v2036_v54 = vmul.f32 %v1972_v59, %v1834_v9  ;;  %v1994_v9 = vld [vmem:[%s3907_s21 + $0x188] sm:$0xff] }
 0x3df   : > { %v1838_v63 = vpop.f32.mrf.mxu0 }
 0x3e0   : > { %2708 = vmatprep.mubr.msk.f32.mxu1 %vm2098_vm4, %v2036_v54  ;;  %v2037_v7 = vmul.f32 %v1973_v35, %v1838_v63  ;;  %v1993_v54 = vld [vmem:[%s3907_s21 + $0x180] sm:$0xff] }
 0x3e1   : > { %v1840_v41 = vpop.f32.mrf.mxu0  ;;  %2325 = vmatmul.mubr.f32.gmra.mxu1 %v2035_v29 }
 0x3e2   : > { %v2038_v6 = vmul.f32 %v1974_v37, %v1840_v41  ;;  %v1996_v41 = vld [vmem:[%s3907_s21 + $0x198] sm:$0xff] }
 0x3e3   : > { %v1844_v60 = vpop.f32.mrf.mxu0 }
 0x3e4   : > { %2709 = vmatprep.mubr.msk.f32.mxu1 %vm2098_vm4, %v2038_v6  ;;  %v2039_v27 = vmul.f32 %v1975_v15, %v1844_v60  ;;  %v1995_v6 = vld [vmem:[%s3907_s21 + $0x190] sm:$0xff] }
 0x3e5   : > { %v1846_v14 = vpop.f32.mrf.mxu0  ;;  %2330 = vmatmul.mubr.f32.gmra.mxu1 %v2037_v7 }
 0x3e6   : > { %v2040_v8 = vmul.f32 %v1976_v50, %v1846_v14  ;;  %v1998_v14 = vld [vmem:[%s3907_s21 + $0x1a8] sm:$0xff] }
 0x3e7   : > { %v1850_v21 = vpop.f32.mrf.mxu0 }
 0x3e8   : > { %2710 = vmatprep.mubr.msk.f32.mxu1 %vm2098_vm4, %v2040_v8  ;;  %v2041_v52 = vmul.f32 %v1977_v25, %v1850_v21  ;;  %v1997_v8 = vld [vmem:[%s3907_s21 + $0x1a0] sm:$0xff] }
 0x3e9   : > { %v1852_v0 = vpop.f32.mrf.mxu0  ;;  %2335 = vmatmul.mubr.f32.gmra.mxu1 %v2039_v27 }
 0x3ea   : > { %v2042_v16 = vmul.f32 %v1978_v5, %v1852_v0  ;;  %v2000_v0 = vld [vmem:[%s3907_s21 + $0x1b8] sm:$0xff] }
 0x3eb   : > { %v1856_v10 = vpop.f32.mrf.mxu0 }
 0x3ec   : > { %2711 = vmatprep.mubr.msk.f32.mxu1 %vm2098_vm4, %v2042_v16  ;;  %v2043_v34 = vmul.f32 %v1979_v24, %v1856_v10  ;;  %v1999_v16 = vld [vmem:[%s3907_s21 + $0x1b0] sm:$0xff] }
 0x3ed   : > { %v1858_v19 = vpop.f32.mrf.mxu0  ;;  %2340 = vmatmul.mubr.f32.gmra.mxu1 %v2041_v52 }
 0x3ee   : > { %v2044_v13 = vmul.f32 %v1980_v30, %v1858_v19  ;;  %v2002_v19 = vld [vmem:[%s3907_s21 + $0x1c8] sm:$0xff] }
 0x3ef   : > { %v1862_v26 = vpop.f32.mrf.mxu0 }
 0x3f0   : > { %2712 = vmatprep.mubr.msk.f32.mxu1 %vm2098_vm4, %v2044_v13  ;;  %v2045_v23 = vmul.f32 %v1981_v62, %v1862_v26  ;;  %v2001_v13 = vld [vmem:[%s3907_s21 + $0x1c0] sm:$0xff] }
 0x3f1   : > { %v1864_v57 = vpop.f32.mrf.mxu0  ;;  %2345 = vmatmul.mubr.f32.gmra.mxu1 %v2043_v34 }
 0x3f2   : > { %v2046_v31 = vmul.f32 %v1982_v36, %v1864_v57  ;;  %v2004_v57 = vld [vmem:[%s3907_s21 + $0x1d8] sm:$0xff] }
 0x3f3   : > { %v1868_v38 = vpop.f32.mrf.mxu0 }
 0x3f4   : > { %2713 = vmatprep.mubr.msk.f32.mxu1 %vm2098_vm4, %v2046_v31  ;;  %v2047_v45 = vmul.f32 %v1983_v43, %v1868_v38  ;;  %v2003_v31 = vld [vmem:[%s3907_s21 + $0x1d0] sm:$0xff] }
 0x3f5   : > { %v1870_v12 = vpop.f32.mrf.mxu0  ;;  %2350 = vmatmul.mubr.f32.gmra.mxu1 %v2045_v23 }
 0x3f6   : > { %v2048_v33 = vmul.f32 %v1984_v40, %v1870_v12  ;;  %v2006_v12 = vld [vmem:[%s3907_s21 + $0x1e8] sm:$0xff] }
 0x3f7   : > { %v1874_v56 = vpop.f32.mrf.mxu0 }
 0x3f8   : > { %2714 = vmatprep.mubr.msk.f32.mxu1 %vm2098_vm4, %v2048_v33  ;;  %v2049_v46 = vmul.f32 %v1985_v61, %v1874_v56  ;;  %v2005_v33 = vld [vmem:[%s3907_s21 + $0x1e0] sm:$0xff] }
 0x3f9   : > { %v1876_v44 = vpop.f32.mrf.mxu0  ;;  %2355 = vmatmul.mubr.f32.gmra.mxu1 %v2047_v45 }
 0x3fa   : > { %v2050_v1 = vmul.f32 %v1986_v39, %v1876_v44  ;;  %v2008_v44 = vld [vmem:[%s3907_s21 + $0x1f8] sm:$0xff] }
 0x3fb   : > { %v1880_v17 = vpop.f32.mrf.mxu0 }
 0x3fc   : > { %2715 = vmatprep.mubr.msk.f32.mxu1 %vm2098_vm4, %v2050_v1  ;;  %v2051_v4 = vmul.f32 %v1987_v18, %v1880_v17  ;;  %v2007_v1 = vld [vmem:[%s3907_s21 + $0x1f0] sm:$0xff]  ;;  %v4009_v18 = vld [vmem:[%s4169_s7] ss:$0 sm:$0xff]  ;;  %s2948_s21 = sshll.u32 %s3007_s20, 4  ;;  %s2949_s21 = int_to_ptr.vmem [resolvable:$false] %s2948_s21 }
 0x3fd   : > { %v1882_v47 = vpop.f32.mrf.mxu0  ;;  %2360 = vmatmul.mubr.f32.gmra.mxu1 %v2049_v46  ;;  %s2950_s24 = scalar_lea.vmem %s2949_s21, 8192  ;;  %p2951_p0 = scmp.lt.s32.totalorder %s4116_s13, %s2949_s21 }
 0x3fe   : > { %v2052_v51 = vmul.f32 %v1988_v42, %v1882_v47  ;;  %p2952_p1 = scmp.lt.s32.totalorder %s2950_s24, %s2944_s22 }
 0x3ff   : > { %v1886_v28 = vpop.f32.mrf.mxu0 }
 0x400   : > { %2716 = vmatprep.mubr.msk.f32.mxu1 %vm2098_vm4, %v2052_v51  ;;  %v2053_v3 = vmul.f32 %v1989_v48, %v1886_v28  ;;  %p2953_p2 = por %p2952_p1, %p2951_p0 }
 0x401   : > { %v1888_v58 = vpop.f32.mrf.mxu0  ;;  %2365 = vmatmul.mubr.f32.gmra.mxu1 %v2051_v4 }
 0x402   : > { %v2054_v53 = vmul.f32 %v1990_v22, %v1888_v58  ;;  %p2954_p3 = pnand %p2953_p2, %p2947_p13 }
 0x403   : > { %v1892_v2 = vpop.f32.mrf.mxu0 }
 0x404   : > { %2717 = vmatprep.mubr.msk.f32.mxu1 %vm2098_vm4, %v2054_v53  ;;  %v2055_v59 = vmul.f32 %v1991_v32, %v1892_v2 }
 0x405   : > { %v1894_v11 = vpop.f32.mrf.mxu0  ;;  %2370 = vmatmul.mubr.f32.gmra.mxu1 %v2053_v3 }
 0x406   : > { %v2056_v55 = vmul.f32 %v1992_v49, %v1894_v11 }
 0x407   : > { %v1898_v20 = vpop.f32.mrf.mxu0 }
 0x408   : > { %2718 = vmatprep.mubr.msk.f32.mxu1 %vm2098_vm4, %v2056_v55  ;;  %v2057_v37 = vmul.f32 %v1993_v54, %v1898_v20 }
 0x409   : > { %v1900_v29 = vpop.f32.mrf.mxu0  ;;  %2375 = vmatmul.mubr.f32.gmra.mxu1 %v2055_v59 }
 0x40a   : > { %v2058_v63 = vmul.f32 %v1994_v9, %v1900_v29 }
 0x40b   : > { %v1904_v35 = vpop.f32.mrf.mxu0 }
 0x40c   : > { %2719 = vmatprep.mubr.msk.f32.mxu1 %vm2098_vm4, %v2058_v63  ;;  %v2059_v50 = vmul.f32 %v1995_v6, %v1904_v35 }
 0x40d   : > { %v1906_v7 = vpop.f32.mrf.mxu0  ;;  %2380 = vmatmul.mubr.f32.gmra.mxu1 %v2057_v37 }
 0x40e   : > { %v2060_v60 = vmul.f32 %v1996_v41, %v1906_v7 }
 0x40f   : > { %v1910_v15 = vpop.f32.mrf.mxu0 }
 0x410   : > { %2720 = vmatprep.mubr.msk.f32.mxu1 %vm2098_vm4, %v2060_v60  ;;  %v2061_v5 = vmul.f32 %v1997_v8, %v1910_v15 }
 0x411   : > { %v1912_v27 = vpop.f32.mrf.mxu0  ;;  %2385 = vmatmul.mubr.f32.gmra.mxu1 %v2059_v50 }
 0x412   : > { %v2062_v21 = vmul.f32 %v1998_v14, %v1912_v27 }
 0x413   : > { %v1916_v25 = vpop.f32.mrf.mxu0 }
 0x414   : > { %2721 = vmatprep.mubr.msk.f32.mxu1 %vm2098_vm4, %v2062_v21  ;;  %v2063_v30 = vmul.f32 %v1999_v16, %v1916_v25 }
 0x415   : > { %v1918_v52 = vpop.f32.mrf.mxu0  ;;  %2390 = vmatmul.mubr.f32.gmra.mxu1 %v2061_v5 }
 0x416   : > { %v2064_v10 = vmul.f32 %v2000_v0, %v1918_v52 }
 0x417   : > { %v1922_v24 = vpop.f32.mrf.mxu0 }
 0x418   : > { %2722 = vmatprep.mubr.msk.f32.mxu1 %vm2098_vm4, %v2064_v10  ;;  %v2065_v36 = vmul.f32 %v2001_v13, %v1922_v24 }
 0x419   : > { %v1924_v34 = vpop.f32.mrf.mxu0  ;;  %2395 = vmatmul.mubr.f32.gmra.mxu1 %v2063_v30 }
 0x41a   : > { %v2066_v26 = vmul.f32 %v2002_v19, %v1924_v34 }
 0x41b   : > { %v1928_v62 = vpop.f32.mrf.mxu0 }
 0x41c   : > { %2723 = vmatprep.mubr.msk.f32.mxu1 %vm2098_vm4, %v2066_v26  ;;  %v2067_v40 = vmul.f32 %v2003_v31, %v1928_v62 }
 0x41d   : > { %v1930_v23 = vpop.f32.mrf.mxu0  ;;  %2400 = vmatmul.mubr.f32.gmra.mxu1 %v2065_v36 }
 0x41e   : > { %v2068_v38 = vmul.f32 %v2004_v57, %v1930_v23 }
 0x41f   : > { %v1934_v43 = vpop.f32.mrf.mxu0 }
 0x420   : > { %2724 = vmatprep.mubr.msk.f32.mxu1 %vm2098_vm4, %v2068_v38  ;;  %v2069_v39 = vmul.f32 %v2005_v33, %v1934_v43 }
 0x421   : > { %v1936_v45 = vpop.f32.mrf.mxu0  ;;  %2405 = vmatmul.mubr.f32.gmra.mxu1 %v2067_v40 }
 0x422   : > { %v2070_v56 = vmul.f32 %v2006_v12, %v1936_v45 }
 0x423   : > { %v1940_v61 = vpop.f32.mrf.mxu0 }
 0x424   : > { %2725 = vmatprep.mubr.msk.f32.mxu1 %vm2098_vm4, %v2070_v56  ;;  %v2071_v42 = vmul.f32 %v2007_v1, %v1940_v61 }
 0x425   : > { %v1942_v46 = vpop.f32.mrf.mxu0  ;;  %2410 = vmatmul.mubr.f32.gmra.mxu1 %v2069_v39 }
 0x426   : > { %v2072_v17 = vmul.f32 %v2008_v44, %v1942_v46 }
 0x428   : > { %2726 = vmatprep.mubr.msk.f32.mxu1 %vm2098_vm4, %v2072_v17 }
 0x429   : > { %2415 = vmatmul.mubr.f32.gmra.mxu1 %v2071_v42 }
 0x46d   : > { %v2261_v47 = vpop.f32.mrf.mxu1 }
 0x46e   : > { %v2262_v51 = vadd.f32 %v4009_v18, %v2261_v47 }
 0x46f   : > { %v2263_v4 = vpop.f32.mrf.mxu1 }
 0x470   : > { %v2420_v28 = vmax.f32 %v2262_v51, 0.0 }
 0x471   : > { %v2266_v22 = vpop.f32.mrf.mxu1 }
 0x472   : > { %2452 = vst.msk [vmem:[%s4014_s10] sm:$0xff] %vm842_vm1, %v2420_v28  ;;  %v2267_v48 = vadd.f32 %v4009_v18, %v2266_v22 }
 0x473   : > { %v2268_v58 = vpop.f32.mrf.mxu1 }
 0x474   : > { %v2421_v53 = vmax.f32 %v2267_v48, 0.0 }
 0x475   : > { %v2271_v3 = vpop.f32.mrf.mxu1 }
 0x476   : > { %2453 = vst.msk [vmem:[%s4014_s10 + $0x8] sm:$0xff] %vm842_vm1, %v2421_v53  ;;  %v2272_v2 = vadd.f32 %v4009_v18, %v2271_v3 }
 0x477   : > { %v2273_v49 = vpop.f32.mrf.mxu1 }
 0x478   : > { %v2422_v32 = vmax.f32 %v2272_v2, 0.0 }
 0x479   : > { %v2276_v11 = vpop.f32.mrf.mxu1 }
 0x47a   : > { %2454 = vst.msk [vmem:[%s4014_s10 + $0x10] sm:$0xff] %vm842_vm1, %v2422_v32  ;;  %v2277_v55 = vadd.f32 %v4009_v18, %v2276_v11 }
 0x47b   : > { %v2278_v59 = vpop.f32.mrf.mxu1 }
 0x47c   : > { %v2423_v20 = vmax.f32 %v2277_v55, 0.0 }
 0x47d   : > { %v2281_v9 = vpop.f32.mrf.mxu1 }
 0x47e   : > { %2455 = vst.msk [vmem:[%s4014_s10 + $0x18] sm:$0xff] %vm842_vm1, %v2423_v20  ;;  %v2282_v54 = vadd.f32 %v4009_v18, %v2281_v9 }
 0x47f   : > { %v2283_v29 = vpop.f32.mrf.mxu1 }
 0x480   : > { %v2424_v63 = vmax.f32 %v2282_v54, 0.0 }
 0x481   : > { %v2286_v37 = vpop.f32.mrf.mxu1 }
 0x482   : > { %2456 = vst.msk [vmem:[%s4014_s10 + $0x20] sm:$0xff] %vm842_vm1, %v2424_v63  ;;  %v2287_v35 = vadd.f32 %v4009_v18, %v2286_v37 }
 0x483   : > { %v2288_v41 = vpop.f32.mrf.mxu1 }
 0x484   : > { %v2425_v6 = vmax.f32 %v2287_v35, 0.0 }
 0x485   : > { %v2291_v7 = vpop.f32.mrf.mxu1 }
 0x486   : > { %2457 = vst.msk [vmem:[%s4014_s10 + $0x28] sm:$0xff] %vm842_vm1, %v2425_v6  ;;  %v2292_v60 = vadd.f32 %v4009_v18, %v2291_v7 }
 0x487   : > { %v2293_v50 = vpop.f32.mrf.mxu1 }
 0x488   : > { %v2426_v15 = vmax.f32 %v2292_v60, 0.0 }
 0x489   : > { %v2296_v14 = vpop.f32.mrf.mxu1 }
 0x48a   : > { %2458 = vst.msk [vmem:[%s4014_s10 + $0x30] sm:$0xff] %vm842_vm1, %v2426_v15  ;;  %v2297_v8 = vadd.f32 %v4009_v18, %v2296_v14 }
 0x48b   : > { %v2298_v27 = vpop.f32.mrf.mxu1 }
 0x48c   : > { %v2427_v21 = vmax.f32 %v2297_v8, 0.0 }
 0x48d   : > { %v2301_v5 = vpop.f32.mrf.mxu1 }
 0x48e   : > { %2459 = vst.msk [vmem:[%s4014_s10 + $0x38] sm:$0xff] %vm842_vm1, %v2427_v21  ;;  %v2302_v25 = vadd.f32 %v4009_v18, %v2301_v5 }
 0x48f   : > { %v2303_v0 = vpop.f32.mrf.mxu1 }
 0x490   : > { %v2428_v16 = vmax.f32 %v2302_v25, 0.0 }
 0x491   : > { %v2306_v52 = vpop.f32.mrf.mxu1 }
 0x492   : > { %2460 = vst.msk [vmem:[%s4014_s10 + $0x40] sm:$0xff] %vm842_vm1, %v2428_v16  ;;  %v2307_v10 = vadd.f32 %v4009_v18, %v2306_v52 }
 0x493   : > { %v2308_v30 = vpop.f32.mrf.mxu1 }
 0x494   : > { %v2429_v24 = vmax.f32 %v2307_v10, 0.0 }
 0x495   : > { %v2311_v19 = vpop.f32.mrf.mxu1 }
 0x496   : > { %2461 = vst.msk [vmem:[%s4014_s10 + $0x48] sm:$0xff] %vm842_vm1, %v2429_v24  ;;  %v2312_v13 = vadd.f32 %v4009_v18, %v2311_v19 }
 0x497   : > { %v2313_v34 = vpop.f32.mrf.mxu1 }
 0x498   : > { %v2430_v26 = vmax.f32 %v2312_v13, 0.0 }
 0x499   : > { %v2316_v36 = vpop.f32.mrf.mxu1 }
 0x49a   : > { %2462 = vst.msk [vmem:[%s4014_s10 + $0x50] sm:$0xff] %vm842_vm1, %v2430_v26  ;;  %v2317_v62 = vadd.f32 %v4009_v18, %v2316_v36 }
 0x49b   : > { %v2318_v57 = vpop.f32.mrf.mxu1 }
 0x49c   : > { %v2431_v31 = vmax.f32 %v2317_v62, 0.0 }
 0x49d   : > { %v2321_v23 = vpop.f32.mrf.mxu1 }
 0x49e   : > { %2463 = vst.msk [vmem:[%s4014_s10 + $0x58] sm:$0xff] %vm842_vm1, %v2431_v31  ;;  %v2322_v38 = vadd.f32 %v4009_v18, %v2321_v23 }
 0x49f   : > { %v2323_v40 = vpop.f32.mrf.mxu1 }
 0x4a0   : > { %v2432_v43 = vmax.f32 %v2322_v38, 0.0 }
 0x4a1   : > { %v2326_v12 = vpop.f32.mrf.mxu1 }
 0x4a2   : > { %2464 = vst.msk [vmem:[%s4014_s10 + $0x60] sm:$0xff] %vm842_vm1, %v2432_v43  ;;  %v2327_v33 = vadd.f32 %v4009_v18, %v2326_v12 }
 0x4a3   : > { %v2328_v45 = vpop.f32.mrf.mxu1 }
 0x4a4   : > { %v2433_v56 = vmax.f32 %v2327_v33, 0.0 }
 0x4a5   : > { %v2331_v39 = vpop.f32.mrf.mxu1 }
 0x4a6   : > { %2465 = vst.msk [vmem:[%s4014_s10 + $0x68] sm:$0xff] %vm842_vm1, %v2433_v56  ;;  %v2332_v61 = vadd.f32 %v4009_v18, %v2331_v39 }
 0x4a7   : > { %v2333_v44 = vpop.f32.mrf.mxu1 }
 0x4a8   : > { %v2434_v1 = vmax.f32 %v2332_v61, 0.0 }
 0x4a9   : > { %v2336_v46 = vpop.f32.mrf.mxu1 }
 0x4aa   : > { %2466 = vst.msk [vmem:[%s4014_s10 + $0x70] sm:$0xff] %vm842_vm1, %v2434_v1  ;;  %v2337_v17 = vadd.f32 %v4009_v18, %v2336_v46 }
 0x4ab   : > { %v2338_v42 = vpop.f32.mrf.mxu1 }
 0x4ac   : > { %v2435_v47 = vmax.f32 %v2337_v17, 0.0 }
 0x4ad   : > { %v2341_v51 = vpop.f32.mrf.mxu1 }
 0x4ae   : > { %2467 = vst.msk [vmem:[%s4014_s10 + $0x78] sm:$0xff] %vm842_vm1, %v2435_v47  ;;  %v2342_v4 = vadd.f32 %v4009_v18, %v2341_v51 }
 0x4af   : > { %v2343_v28 = vpop.f32.mrf.mxu1 }
 0x4b0   : > { %v2436_v22 = vmax.f32 %v2342_v4, 0.0 }
 0x4b1   : > { %v2346_v48 = vpop.f32.mrf.mxu1 }
 0x4b2   : > { %2468 = vst.msk [vmem:[%s4014_s10 + $0x80] sm:$0xff] %vm842_vm1, %v2436_v22  ;;  %v2347_v58 = vadd.f32 %v4009_v18, %v2346_v48 }
 0x4b3   : > { %v2348_v53 = vpop.f32.mrf.mxu1 }
 0x4b4   : > { %v2437_v3 = vmax.f32 %v2347_v58, 0.0 }
 0x4b5   : > { %v2351_v2 = vpop.f32.mrf.mxu1 }
 0x4b6   : > { %2469 = vst.msk [vmem:[%s4014_s10 + $0x88] sm:$0xff] %vm842_vm1, %v2437_v3  ;;  %v2352_v49 = vadd.f32 %v4009_v18, %v2351_v2 }
 0x4b7   : > { %v2353_v32 = vpop.f32.mrf.mxu1 }
 0x4b8   : > { %v2438_v11 = vmax.f32 %v2352_v49, 0.0 }
 0x4b9   : > { %v2356_v55 = vpop.f32.mrf.mxu1 }
 0x4ba   : > { %2470 = vst.msk [vmem:[%s4014_s10 + $0x90] sm:$0xff] %vm842_vm1, %v2438_v11  ;;  %v2357_v59 = vadd.f32 %v4009_v18, %v2356_v55 }
 0x4bb   : > { %v2358_v20 = vpop.f32.mrf.mxu1 }
 0x4bc   : > { %v2439_v9 = vmax.f32 %v2357_v59, 0.0 }
 0x4bd   : > { %v2361_v54 = vpop.f32.mrf.mxu1 }
 0x4be   : > { %2471 = vst.msk [vmem:[%s4014_s10 + $0x98] sm:$0xff] %vm842_vm1, %v2439_v9  ;;  %v2362_v29 = vadd.f32 %v4009_v18, %v2361_v54 }
 0x4bf   : > { %v2363_v63 = vpop.f32.mrf.mxu1 }
 0x4c0   : > { %v2440_v37 = vmax.f32 %v2362_v29, 0.0 }
 0x4c1   : > { %v2366_v35 = vpop.f32.mrf.mxu1 }
 0x4c2   : > { %2472 = vst.msk [vmem:[%s4014_s10 + $0xa0] sm:$0xff] %vm842_vm1, %v2440_v37  ;;  %v2367_v41 = vadd.f32 %v4009_v18, %v2366_v35 }
 0x4c3   : > { %v2368_v6 = vpop.f32.mrf.mxu1 }
 0x4c4   : > { %v2441_v7 = vmax.f32 %v2367_v41, 0.0 }
 0x4c5   : > { %v2371_v60 = vpop.f32.mrf.mxu1 }
 0x4c6   : > { %2473 = vst.msk [vmem:[%s4014_s10 + $0xa8] sm:$0xff] %vm842_vm1, %v2441_v7  ;;  %v2372_v50 = vadd.f32 %v4009_v18, %v2371_v60 }
 0x4c7   : > { %v2373_v15 = vpop.f32.mrf.mxu1 }
 0x4c8   : > { %v2442_v14 = vmax.f32 %v2372_v50, 0.0 }
 0x4c9   : > { %v2376_v8 = vpop.f32.mrf.mxu1 }
 0x4ca   : > { %2474 = vst.msk [vmem:[%s4014_s10 + $0xb0] sm:$0xff] %vm842_vm1, %v2442_v14  ;;  %v2377_v27 = vadd.f32 %v4009_v18, %v2376_v8 }
 0x4cb   : > { %v2378_v21 = vpop.f32.mrf.mxu1 }
 0x4cc   : > { %v2443_v5 = vmax.f32 %v2377_v27, 0.0 }
 0x4cd   : > { %v2381_v25 = vpop.f32.mrf.mxu1 }
 0x4ce   : > { %2475 = vst.msk [vmem:[%s4014_s10 + $0xb8] sm:$0xff] %vm842_vm1, %v2443_v5  ;;  %v2382_v0 = vadd.f32 %v4009_v18, %v2381_v25 }
 0x4cf   : > { %v2383_v16 = vpop.f32.mrf.mxu1 }
 0x4d0   : > { %v2444_v52 = vmax.f32 %v2382_v0, 0.0 }
 0x4d1   : > { %v2386_v10 = vpop.f32.mrf.mxu1 }
 0x4d2   : > { %2476 = vst.msk [vmem:[%s4014_s10 + $0xc0] sm:$0xff] %vm842_vm1, %v2444_v52  ;;  %v2387_v30 = vadd.f32 %v4009_v18, %v2386_v10 }
 0x4d3   : > { %v2388_v24 = vpop.f32.mrf.mxu1 }
 0x4d4   : > { %v2445_v19 = vmax.f32 %v2387_v30, 0.0 }
 0x4d5   : > { %v2391_v13 = vpop.f32.mrf.mxu1 }
 0x4d6   : > { %2477 = vst.msk [vmem:[%s4014_s10 + $0xc8] sm:$0xff] %vm842_vm1, %v2445_v19  ;;  %v2392_v34 = vadd.f32 %v4009_v18, %v2391_v13 }
 0x4d7   : > { %v2393_v26 = vpop.f32.mrf.mxu1 }
 0x4d8   : > { %v2446_v36 = vmax.f32 %v2392_v34, 0.0 }
 0x4d9   : > { %v2396_v62 = vpop.f32.mrf.mxu1 }
 0x4da   : > { %2478 = vst.msk [vmem:[%s4014_s10 + $0xd0] sm:$0xff] %vm842_vm1, %v2446_v36  ;;  %v2397_v57 = vadd.f32 %v4009_v18, %v2396_v62 }
 0x4db   : > { %v2398_v31 = vpop.f32.mrf.mxu1 }
 0x4dc   : > { %v2447_v23 = vmax.f32 %v2397_v57, 0.0 }
 0x4dd   : > { %v2401_v38 = vpop.f32.mrf.mxu1 }
 0x4de   : > { %2479 = vst.msk [vmem:[%s4014_s10 + $0xd8] sm:$0xff] %vm842_vm1, %v2447_v23  ;;  %v2402_v40 = vadd.f32 %v4009_v18, %v2401_v38 }
 0x4df   : > { %v2403_v43 = vpop.f32.mrf.mxu1 }
 0x4e0   : > { %v2448_v12 = vmax.f32 %v2402_v40, 0.0 }
 0x4e1   : > { %v2406_v33 = vpop.f32.mrf.mxu1 }
 0x4e2   : > { %2480 = vst.msk [vmem:[%s4014_s10 + $0xe0] sm:$0xff] %vm842_vm1, %v2448_v12  ;;  %v2407_v45 = vadd.f32 %v4009_v18, %v2406_v33 }
 0x4e3   : > { %v2408_v56 = vpop.f32.mrf.mxu1 }
 0x4e4   : > { %v2449_v39 = vmax.f32 %v2407_v45, 0.0 }
 0x4e5   : > { %v2411_v61 = vpop.f32.mrf.mxu1 }
 0x4e6   : > { %2481 = vst.msk [vmem:[%s4014_s10 + $0xe8] sm:$0xff] %vm842_vm1, %v2449_v39  ;;  %v2412_v44 = vadd.f32 %v4009_v18, %v2411_v61 }
 0x4e7   : > { %v2413_v1 = vpop.f32.mrf.mxu1 }
 0x4e8   : > { %v2450_v46 = vmax.f32 %v2412_v44, 0.0 }
 0x4e9   : > { %v2416_v17 = vpop.f32.mrf.mxu1 }
 0x4ea   : > { %2482 = vst.msk [vmem:[%s4014_s10 + $0xf0] sm:$0xff] %vm842_vm1, %v2450_v46  ;;  %v2417_v42 = vadd.f32 %v4009_v18, %v2416_v17 }
 0x4eb   : > { %v2418_v47 = vpop.f32.mrf.mxu1 }
 0x4ec   : > { %v2451_v51 = vmax.f32 %v2417_v42, 0.0 }
 0x4ee   : > { %2483 = vst.msk [vmem:[%s4014_s10 + $0xf8] sm:$0xff] %vm842_vm1, %v2451_v51 }
 0x4ef   : > { %2957 = shalt.err (!%p2954_p3)
}
 0x4f0   : > { %s2958_s23 = scalar_lea.hbm %s4114_s19, 4096  ;;  %s2962_s10 = scalar_lea.hbm %s4170_s8, 8192 }
 0x4f1   : > { %p2959_p4 = scmp.ne.s32.totalorder %s4114_s19, %s2958_s23  ;;  %p2963_p9 = scmp.lt.s32.totalorder %s4114_s19, %s4170_s8 }
 0x4f2   : > { %p2964_p10 = scmp.lt.s32.totalorder %s2962_s10, %s2958_s23 }
 0x4f3   : > { %p2960_p7 = pnand %p2959_p4, %p3093_p5 }
 0x4f4   : > { %p2965_p11 = por %p2964_p10, %p2963_p9 }
 0x4f5   : > { %p2961_p8 = pneg %p2960_p7 }
 0x4f7   : > { %p2966_p12 = pnand %p2965_p11, %p2961_p8 }
 0x4f9   : > { %2969 = shalt.err (!%p2966_p12)
}
 0x4fa   : > { %s3008_s18 = smov 128   ;;  %s3009_s22 = smov 8  }
 0x4fb   : > { %2774 = dma.vmem_to_hbm [thread:$0]  (%p3093_p5), %s4116_s13, 4096, %s4114_s19, %s4122_s9, %s3008_s18, %s3008_s18, %s3009_s22  }
 0x4fc PF: > { %p2780_p13 = scmp.ge.s32.totalorder %s3004_s30, 2  ;;  %s2513_s20 = sand.u32 1, %s2992_s27  }
 0x4fd   : > { %s2514_s21 = scalar_lea.sflag [#allocation3], %s2513_s20 }
 0x4fe   : > { %p2777_p0 = pnand %p2780_p13, %p3097_p6 }
 0x500   : > { %p2778_p1 = pneg %p2777_p0 }
 0x502   : > { %2987 = dma.done.wait (%p2778_p1), %s2514_s21, 4096  }
 0x503   : > { %2989 = vsyncadd (%p2778_p1), %s2514_s21, 4294963200  ;;  %p18_p2 = scmp.ge.s32.totalorder %s3080_s11, 4   ;;  %s4173_s27 = smov %s2996_s28 }
 0x504   : > { %s4174_s28 = smov %s3000_s29  ;;  %s4175_s29 = smov %s3091_s14 }
 0x505   : > { %s4176_s30 = smov %s3080_s11  ;;  %20 = sbr.rel (!%p18_p2) target bundleno = 3 (0x3), region = 93 }
 0x50a   :  { %2519 = vsyncpa [#allocation3], 1 }
 0x50b   :  { %2521 = vsyncpa [#allocation3 + $0x1], 1 }

</bundles_post_ra>
